<compile_context>
chip_gen: v7x
topology: tpu7x:2x2x1
jax: 0.10.0
libtpu: 0.0.40
codegen_flags: <defaults>
</compile_context>

<pallas_src>
import jax
import jax.numpy as jnp
from jax import lax
from jax.experimental import pallas as pl
from jax.experimental.pallas import tpu as pltpu


_VMEM_LIMIT = 48 * 1024 * 1024  # safe on v7x (64 MiB physical); raise on v5e/v6e
_CP_ROWS = pltpu.CompilerParams(dimension_semantics=("parallel",),
                                vmem_limit_bytes=_VMEM_LIMIT)
_CP_RECUR = pltpu.CompilerParams(dimension_semantics=("parallel", "arbitrary"),
                                 vmem_limit_bytes=_VMEM_LIMIT)


def _round_up(n, m):
    return ((n + m - 1) // m) * m


def _divisor_block(n, target):
    """Largest block <= target dividing n (time axis only; padding T would corrupt
    the backward recurrence's initial steps)."""
    b = min(n, target)
    while n % b:
        b -= 1
    return b


def _pad_rows(x, n_rows):
    if x.shape[0] == n_rows:
        return x
    pad = [(0, n_rows - x.shape[0])] + [(0, 0)] * (x.ndim - 1)
    return jnp.pad(x, pad)


# ----------------------------- Pallas kernels ------------------------------

def input_proj_kernel(x_ref, w_ref, b_ref, o1f_ref, o1b_ref, o2f_ref, o2b_ref):
    """One stacked GEMM: x @ [Wih1_f | Wih1_b | Wih2_f | Wih2_b] + bias.

    x: [rb, Ep]   w: [Ep, 12Hp]   b: [1, 12Hp] (zeros in the re-encoder halves).
    Outputs: four [rb, 3Hp] slabs; 3Hp is a multiple of 128 so the slices are
    aligned lane-dense views.
    """
    acc = jnp.dot(x_ref[...], w_ref[...],
                  preferred_element_type=jnp.float32) + b_ref[...]
    G = o1f_ref.shape[-1]                      # 3Hp
    o1f_ref[...] = acc[:, 0:G]
    o1b_ref[...] = acc[:, G:2 * G]
    o2f_ref[...] = acc[:, 2 * G:3 * G]
    o2b_ref[...] = acc[:, 3 * G:4 * G]


def _bidir_gru_step(gxf, gxb, h2, whh_bd, bhh, Hp):
    """Fused fwd+bwd PyTorch GRU cell (gate order r,z,n).

    h2 = [hf | hb] : [bb, 2Hp];  whh_bd block-diagonal [2Hp, 6Hp] so a single MXU
    dot (K=2Hp=256 on Hp=128) produces both directions' hidden projections.
    """
    gh = jnp.dot(h2, whh_bd, preferred_element_type=jnp.float32) + bhh
    hf = h2[:, :Hp]
    hb = h2[:, Hp:]
    rf = jax.nn.sigmoid(gxf[:, 0:Hp] + gh[:, 0:Hp])
    zf = jax.nn.sigmoid(gxf[:, Hp:2 * Hp] + gh[:, Hp:2 * Hp])
    nf = jnp.tanh(gxf[:, 2 * Hp:3 * Hp] + rf * gh[:, 2 * Hp:3 * Hp])
    hf_new = (1.0 - zf) * nf + zf * hf
    rb_ = jax.nn.sigmoid(gxb[:, 0:Hp] + gh[:, 3 * Hp:4 * Hp])
    zb = jax.nn.sigmoid(gxb[:, Hp:2 * Hp] + gh[:, 4 * Hp:5 * Hp])
    nb = jnp.tanh(gxb[:, 2 * Hp:3 * Hp] + rb_ * gh[:, 5 * Hp:6 * Hp])
    hb_new = (1.0 - zb) * nb + zb * hb
    return hf_new, hb_new


def bigru_kernel(gxf_ref, gxb_ref, whh_ref, bhh_ref, of_ref, ob_ref, h2_scr):
    """Fused bidirectional GRU recurrence over one (batch-block, time-block) tile.

    Grid = (batch "parallel", time "arbitrary").  gxb / ob use a reversed time
    index_map so the backward stream needs no x[::-1] HBM copy.
    """
    Hp = of_ref.shape[-1]
    Tb = gxf_ref.shape[0]

    @pl.when(pl.program_id(1) == 0)        # re-init state at the start of each batch block
    def _init():
        h2_scr[...] = jnp.zeros_like(h2_scr)

    whh = whh_ref[...]
    bhh = bhh_ref[...]

    def step(s, carry):
        sb = Tb - 1 - s
        hf_new, hb_new = _bidir_gru_step(gxf_ref[s], gxb_ref[sb],
                                         h2_scr[...], whh, bhh, Hp)
        h2_scr[:, :Hp] = hf_new
        h2_scr[:, Hp:] = hb_new
        of_ref[s] = hf_new                 # [bb>=8, Hp=128] -> dense vst
        ob_ref[sb] = hb_new
        return carry

    lax.fori_loop(0, Tb, step, 0, unroll=2)


def rationale_kernel(hf_ref, hb_ref, wdf_ref, wdb_ref, gum_ref,
                     p2f_ref, p2b_ref, b2f_ref, b2b_ref,
                     sel_ref, gx2f_ref, gx2b_ref):
    """Fused hard-gumbel rationale selection + re-encoder input gating.

    Hard argmax over 2 logits == sign of the logit difference, so the z-projection
    is a lane-dense elementwise mul + XLU lane reduction instead of a [.,H]@[H,2]
    MXU op.  gum_ref already folds (gumbel1-gumbel0) + bz_diff + padding mask.
    sel*(x@Wih2) == (sel*x)@Wih2 for sel in {0,1}; bih2 is added after gating.
    """
    score = (jnp.sum(hf_ref[...] * wdf_ref[...], axis=-1, keepdims=True)
             + jnp.sum(hb_ref[...] * wdb_ref[...], axis=-1, keepdims=True)
             + gum_ref[...])
    sel = (score > 0.0).astype(jnp.float32)
    # TODO(synk): sel is a [rb,1] lane-sparse store (tiny payload); pack lane-dense
    # if it ever shows up in profiles.
    sel_ref[...] = sel
    gx2f_ref[...] = p2f_ref[...] * sel + b2f_ref[...]
    gx2b_ref[...] = p2b_ref[...] * sel + b2b_ref[...]


def bigru_pool_cls_kernel(gxf_ref, gxb_ref, whh_ref, bhh_ref,
                          num_ref, wc_ref, bc_ref,
                          pooled_ref, out_ref, h2_scr, sum_scr):
    """Fused bidirectional GRU + running time-sum + mean-by-count + classifier.

    Per-timestep hidden states never touch HBM; pooled feature and logits are
    emitted once per batch block in the epilogue.
    """
    Hp = h2_scr.shape[-1] // 2
    Tb = gxf_ref.shape[0]

    @pl.when(pl.program_id(1) == 0)
    def _init():
        h2_scr[...] = jnp.zeros_like(h2_scr)
        sum_scr[...] = jnp.zeros_like(sum_scr)

    whh = whh_ref[...]
    bhh = bhh_ref[...]

    def step(s, carry):
        sb = Tb - 1 - s
        hf_new, hb_new = _bidir_gru_step(gxf_ref[s], gxb_ref[sb],
                                         h2_scr[...], whh, bhh, Hp)
        h2_scr[:, :Hp] = hf_new
        h2_scr[:, Hp:] = hb_new
        sum_scr[:, :Hp] += hf_new
        sum_scr[:, Hp:] += hb_new
        return carry

    lax.fori_loop(0, Tb, step, 0, unroll=2)

    @pl.when(pl.program_id(1) == pl.num_programs(1) - 1)
    def _epilogue():
        pooled = sum_scr[...] / num_ref[...]
        pooled_ref[...] = pooled
        out_ref[...] = (jnp.dot(pooled, wc_ref[...],
                                preferred_element_type=jnp.float32) + bc_ref[...])


# ------------------------------- wrappers -----------------------------------

def input_projection(x2d, w, b):
    N, Ep = x2d.shape
    H3 = w.shape[1] // 4
    rb = min(1024, _round_up(N, 8))
    Np = _round_up(N, rb)
    xp = _pad_rows(x2d, Np)
    row = lambda cols: pl.BlockSpec((rb, cols), lambda i: (i, 0))
    const = lambda arr: pl.BlockSpec(arr.shape, lambda i: (0, 0))
    outs = pl.pallas_call(
        input_proj_kernel,
        grid=(Np // rb,),
        in_specs=[row(Ep), const(w), const(b)],
        out_specs=tuple(row(H3) for _ in range(4)),
        out_shape=tuple(jax.ShapeDtypeStruct((Np, H3), jnp.float32)
                        for _ in range(4)),
        compiler_params=_CP_ROWS,
    )(xp, w, b)
    return tuple(o[:N] for o in outs)


def bigru(gxf, gxb, whh, bhh, bb=8, tb_target=128):
    T, Bp, H3 = gxf.shape
    Hp = H3 // 3
    tb = _divisor_block(T, tb_target)
    nt = T // tb
    nb = Bp // bb
    fwd = lambda ib, it: (it, ib, 0)
    bwd = lambda ib, it: (nt - 1 - it, ib, 0)
    const = lambda arr: pl.BlockSpec(arr.shape, lambda ib, it: (0, 0))
    return pl.pallas_call(
        bigru_kernel,
        grid=(nb, nt),
        in_specs=[pl.BlockSpec((tb, bb, H3), fwd),
                  pl.BlockSpec((tb, bb, H3), bwd),
                  const(whh), const(bhh)],
        out_specs=(pl.BlockSpec((tb, bb, Hp), fwd),
                   pl.BlockSpec((tb, bb, Hp), bwd)),
        out_shape=(jax.ShapeDtypeStruct((T, Bp, Hp), jnp.float32),
                   jax.ShapeDtypeStruct((T, Bp, Hp), jnp.float32)),
        scratch_shapes=[pltpu.VMEM((bb, 2 * Hp), jnp.float32)],
        compiler_params=_CP_RECUR,
    )(gxf, gxb, whh, bhh)


def rationale(hf2d, hb2d, wdf, wdb, gum, p2f, p2b, b2f, b2b):
    N, Hp = hf2d.shape
    H3 = p2f.shape[1]
    rb = min(1024, _round_up(N, 8))
    Np = _round_up(N, rb)
    hf_p, hb_p, gum_p, p2f_p, p2b_p = (_pad_rows(a, Np)
                                       for a in (hf2d, hb2d, gum, p2f, p2b))
    row = lambda cols: pl.BlockSpec((rb, cols), lambda i: (i, 0))
    const = lambda arr: pl.BlockSpec(arr.shape, lambda i: (0, 0))
    sel, g2f, g2b = pl.pallas_call(
        rationale_kernel,
        grid=(Np // rb,),
        in_specs=[row(Hp), row(Hp), const(wdf), const(wdb), row(1),
                  row(H3), row(H3), const(b2f), const(b2b)],
        out_specs=(row(1), row(H3), row(H3)),
        out_shape=(jax.ShapeDtypeStruct((Np, 1), jnp.float32),
                   jax.ShapeDtypeStruct((Np, H3), jnp.float32),
                   jax.ShapeDtypeStruct((Np, H3), jnp.float32)),
        compiler_params=_CP_ROWS,
    )(hf_p, hb_p, wdf, wdb, gum_p, p2f_p, p2b_p, b2f, b2b)
    return sel[:N], g2f[:N], g2b[:N]


def bigru_pool_classify(gxf, gxb, whh, bhh, num, wc, bc, bb=8, tb_target=128):
    T, Bp, H3 = gxf.shape
    Hp = H3 // 3
    Cp = wc.shape[1]
    tb = _divisor_block(T, tb_target)
    nt = T // tb
    nb = Bp // bb
    fwd = lambda ib, it: (it, ib, 0)
    bwd = lambda ib, it: (nt - 1 - it, ib, 0)
    const = lambda arr: pl.BlockSpec(arr.shape, lambda ib, it: (0, 0))
    brow = lambda cols: pl.BlockSpec((bb, cols), lambda ib, it: (ib, 0))
    return pl.pallas_call(
        bigru_pool_cls_kernel,
        grid=(nb, nt),
        in_specs=[pl.BlockSpec((tb, bb, H3), fwd),
                  pl.BlockSpec((tb, bb, H3), bwd),
                  const(whh), const(bhh),
                  brow(1), const(wc), const(bc)],
        out_specs=(brow(2 * Hp), brow(Cp)),
        out_shape=(jax.ShapeDtypeStruct((Bp, 2 * Hp), jnp.float32),
                   jax.ShapeDtypeStruct((Bp, Cp), jnp.float32)),
        scratch_shapes=[pltpu.VMEM((bb, 2 * Hp), jnp.float32),
                        pltpu.VMEM((bb, 2 * Hp), jnp.float32)],
        compiler_params=_CP_RECUR,
    )(gxf, gxb, whh, bhh, num, wc, bc)


# ------------------------- parameter preparation ----------------------------

def prepare_params(params):
    """Pad H/E/C to multiples of 128 (lane-dense) and pre-stack/transpose weights.

    Zero padding + zero initial state keeps padded hidden lanes exactly 0 through
    the GRU, so results on the real lanes are unchanged.
    """
    enc, renc = params['enc'], params['renc']
    E = params['emb'].shape[1]
    H = enc['whh_f'].shape[1]
    C = params['cls_w'].shape[0]
    Ep = _round_up(E, 128)
    Hp = _round_up(H, 128)            # 3Hp, 6Hp, 12Hp all multiples of 128
    Cp = _round_up(C, 128)

    def pad_gate_rows(w, ncols_pad):
        out = jnp.zeros((3 * Hp, ncols_pad), jnp.float32)
        for g in range(3):            # place gate g (r,z,n) at row offset g*Hp
            out = out.at[g * Hp:g * Hp + H, :w.shape[1]].set(w[g * H:(g + 1) * H])
        return out

    def pad_gate_vec(v):
        out = jnp.zeros((3 * Hp,), jnp.float32)
        for g in range(3):
            out = out.at[g * Hp:g * Hp + H].set(v[g * H:(g + 1) * H])
        return out

    def prep_dir(p, suf):
        return dict(wih=pad_gate_rows(p['wih_' + suf], Ep),
                    whh=pad_gate_rows(p['whh_' + suf], Hp),
                    bih=pad_gate_vec(p['bih_' + suf]),
                    bhh=pad_gate_vec(p['bhh_' + suf]))

    e_f, e_b = prep_dir(enc, 'f'), prep_dir(enc, 'b')
    r_f, r_b = prep_dir(renc, 'f'), prep_dir(renc, 'b')

    # one stacked input-projection weight for both GRUs / both directions
    w12 = jnp.concatenate([e_f['wih'].T, e_b['wih'].T,
                           r_f['wih'].T, r_b['wih'].T], axis=1)        # [Ep, 12Hp]
    b12 = jnp.concatenate([e_f['bih'], e_b['bih'],
                           jnp.zeros(3 * Hp, jnp.float32),
                           jnp.zeros(3 * Hp, jnp.float32)]).reshape(1, -1)

    def blockdiag_whh(df, db):
        w = jnp.zeros((2 * Hp, 6 * Hp), jnp.float32)
        w = w.at[:Hp, :3 * Hp].set(df['whh'].T)
        w = w.at[Hp:, 3 * Hp:].set(db['whh'].T)
        b = jnp.concatenate([df['bhh'], db['bhh']]).reshape(1, -1)
        return w, b

    enc_whh, enc_bhh = blockdiag_whh(e_f, e_b)
    renc_whh, renc_bhh = blockdiag_whh(r_f, r_b)

    # hard-argmax-over-2 == sign of the logit difference -> single diff vector
    zw = params['z_w']                                                 # [2, 2H]
    zdiff = zw[1] - zw[0]
    wdf = jnp.zeros((1, Hp), jnp.float32).at[0, :H].set(zdiff[:H])
    wdb = jnp.zeros((1, Hp), jnp.float32).at[0, :H].set(zdiff[H:])
    bz_diff = params['z_b'][1] - params['z_b'][0]

    # classifier fused across both directions, padded to Cp lanes
    cw = params['cls_w']                                               # [C, 2H]
    wc = jnp.zeros((2 * Hp, Cp), jnp.float32)
    wc = wc.at[:H, :C].set(cw[:, :H].T)
    wc = wc.at[Hp:Hp + H, :C].set(cw[:, H:].T)
    bc = jnp.zeros((1, Cp), jnp.float32).at[0, :C].set(params['cls_b'])

    emb = jnp.zeros((params['emb'].shape[0], Ep), jnp.float32)
    emb = emb.at[:, :E].set(params['emb'])

    return dict(emb=emb, w12=w12, b12=b12,
                enc_whh=enc_whh, enc_bhh=enc_bhh,
                renc_whh=renc_whh, renc_bhh=renc_bhh,
                renc_bif=r_f['bih'].reshape(1, -1),
                renc_bib=r_b['bih'].reshape(1, -1),
                wdf=wdf, wdb=wdb, bz_diff=bz_diff, wc=wc, bc=bc,
                dims=dict(E=E, Ep=Ep, H=H, Hp=Hp, C=C, Cp=Cp))


# ------------------------- FedIC forward (Pallas) ---------------------------

def fedic_forward(kp, documents, sent_len, gumbel_noise, alpha_rationle):
    eps = 1e-8
    d = kp['dims']
    H, Hp, C, Ep = d['H'], d['Hp'], d['C'], d['Ep']
    B, T = documents.shape
    Bp = max(8, _round_up(B, 8))                     # sublane-dense batch blocks
    docs_p = jnp.zeros((Bp, T), documents.dtype).at[:B].set(documents)
    docs_tb = docs_p.T                               # [T, Bp] time-major
    mask_tb = jnp.sign(docs_tb).astype(jnp.float32)
    # TODO(synk): fuse this gather into the projection kernel (scalar-prefetch DMA).
    embed = kp['emb'][docs_tb]                       # [T, Bp, Ep]
    N = T * Bp

    # stage 1: one stacked [N,Ep]@[Ep,12Hp] GEMM (both GRUs, both directions)
    gx1f, gx1b, p2f, p2b = input_projection(embed.reshape(N, Ep),
                                            kp['w12'], kp['b12'])

    # stage 2: fused bidirectional encoder recurrence
    hf, hb = bigru(gx1f.reshape(T, Bp, 3 * Hp), gx1b.reshape(T, Bp, 3 * Hp),
                   kp['enc_whh'], kp['enc_bhh'])

    # stage 3: rationale selection (gumbel/bias/mask folded into one scalar per row)
    gdiff = gumbel_noise[..., 1] - gumbel_noise[..., 0] + kp['bz_diff']   # [B, T]
    gdiff_p = jnp.full((Bp, T), -1e30, jnp.float32).at[:B].set(gdiff)
    gum_eff = jnp.where(mask_tb > 0, gdiff_p.T, -1e30).reshape(N, 1)
    sel2d, gx2f, gx2b = rationale(hf.reshape(N, Hp), hb.reshape(N, Hp),
                                  kp['wdf'], kp['wdb'], gum_eff,
                                  p2f, p2b, kp['renc_bif'], kp['renc_bib'])

    sel_tb = sel2d.reshape(T, Bp)
    num = jnp.sum(sel_tb, axis=0).reshape(Bp, 1)
    num = num + (num == 0.0).astype(jnp.float32)

    # stage 4: fused re-encoder recurrence + mean pool + classifier (no swf in HBM)
    pooled, out_p = bigru_pool_classify(gx2f.reshape(T, Bp, 3 * Hp),
                                        gx2b.reshape(T, Bp, 3 * Hp),
                                        kp['renc_whh'], kp['renc_bhh'],
                                        num, kp['wc'], kp['bc'])
    output = out_p[:B, :C]
    s_w = jnp.concatenate([pooled[:B, :H], pooled[:B, Hp:Hp + H]], axis=1)

    # side attributes (stored, not returned, in the PyTorch module) — glue
    sel_bt = sel_tb.T[:B]                            # [B, T]
    infor_loss = jnp.abs(sel_bt.sum(-1) / (sent_len + eps) - alpha_rationle).mean()
    regular = (jnp.abs(sel_bt[:, 1:] - sel_bt[:, :-1]).sum(1)
               / (sent_len - 1 + eps)).mean()
    return output, sel_bt, s_w, infor_loss, regular


# ------------------------- pure-JAX reference check -------------------------

def _gru_cell_ref(x, h, wih, whh, bih, bhh):
    H = whh.shape[1]
    gx = x @ wih.T + bih
    gh = h @ whh.T + bhh
    r = jax.nn.sigmoid(gx[:, :H] + gh[:, :H])
    z = jax.nn.sigmoid(gx[:, H:2 * H] + gh[:, H:2 * H])
    n = jnp.tanh(gx[:, 2 * H:] + r * gh[:, 2 * H:])
    return (1.0 - z) * n + z * h


def _bidir_gru_ref(x, p):
    B = x.shape[0]
    H = p['whh_f'].shape[1]

    def run(xs, wih, whh, bih, bhh):
        def f(h, xt):
            h2 = _gru_cell_ref(xt, h, wih, whh, bih, bhh)
            return h2, h2
        _, ys = lax.scan(f, jnp.zeros((B, H), jnp.float32), xs)
        return ys

    xt = jnp.transpose(x, (1, 0, 2))
    fwd = run(xt, p['wih_f'], p['whh_f'], p['bih_f'], p['bhh_f'])
    bwd = run(xt[::-1], p['wih_b'], p['whh_b'], p['bih_b'], p['bhh_b'])[::-1]
    return jnp.transpose(jnp.concatenate([fwd, bwd], -1), (1, 0, 2))


def _forward_ref(params, documents, gumbel):
    embed = params['emb'][documents]
    mask = jnp.sign(documents).astype(jnp.float32)
    en = _bidir_gru_ref(embed, params['enc'])
    z = en @ params['z_w'].T + params['z_b']
    y = z + gumbel
    sel = (y[..., 1] > y[..., 0]).astype(jnp.float32) * mask
    num = sel.sum(1, keepdims=True)
    num = num + (num == 0).astype(jnp.float32)
    word = embed * sel[..., None]
    swf = _bidir_gru_ref(word, params['renc'])
    s_w = swf.sum(1) / num
    out = s_w @ params['cls_w'].T + params['cls_b']
    return out, sel, s_w


# ----------------------------------- main ------------------------------------

if __name__ == "__main__":
    key = jax.random.PRNGKey(0)
    # TODO(synk): module hardcodes Embedding(339503, 200); small synthetic
    # vocab/embed_dim used here for a runnable test.
    VOCAB, E, H, C = 1000, 32, 16, 4      # embed_dim, lstm_hidden_dim, class_num
    B, T = 2, 8
    alpha_rationle = 0.5

    keys = jax.random.split(key, 12)

    def u(k, shape, scale):
        return jax.random.uniform(k, shape, jnp.float32, -scale, scale)

    sH = 1.0 / float(jnp.sqrt(H))
    sD = 1.0 / float(jnp.sqrt(2 * H))

    def gru_params(k):
        ks = jax.random.split(k, 8)
        return dict(
            wih_f=u(ks[0], (3 * H, E), sH), whh_f=u(ks[1], (3 * H, H), sH),
            bih_f=u(ks[2], (3 * H,), sH),   bhh_f=u(ks[3], (3 * H,), sH),
            wih_b=u(ks[4], (3 * H, E), sH), whh_b=u(ks[5], (3 * H, H), sH),
            bih_b=u(ks[6], (3 * H,), sH),   bhh_b=u(ks[7], (3 * H,), sH),
        )

    params = dict(
        emb=jax.random.normal(keys[0], (VOCAB, E), jnp.float32),
        enc=gru_params(keys[1]),
        renc=gru_params(keys[2]),
        z_w=u(keys[3], (2, 2 * H), sD),
        z_b=u(keys[4], (2,), sD),
        cls_w=u(keys[5], (C, 2 * H), sD),
        cls_b=u(keys[6], (C,), sD),
    )

    documents = jax.random.randint(keys[7], (B, T), 1, VOCAB)
    documents = documents.at[:, -2:].set(0)                 # padding tokens
    sent_len = jnp.sum(jnp.sign(documents), axis=1).astype(jnp.float32)
    gumbel = jax.random.gumbel(keys[8], (B, T, 2), jnp.float32)  # glue: RNG

    kp = prepare_params(params)
    out, sel, s_w, il, reg = fedic_forward(kp, documents, sent_len,
                                           gumbel, alpha_rationle)
    jax.block_until_ready((out, sel, s_w, il, reg))

    out_ref, sel_ref, s_w_ref = _forward_ref(params, documents, gumbel)
    assert jnp.allclose(out, out_ref, atol=1e-3, rtol=1e-3), "output mismatch"
    assert jnp.allclose(sel, sel_ref), "rationale mask mismatch"
    assert jnp.allclose(s_w, s_w_ref, atol=1e-3, rtol=1e-3), "pooled feature mismatch"

    print("KERNEL_OK")
</pallas_src>

<mosaic_0001>
module attributes {stable_mosaic.version = 11 : i64} {
  func.func @input_proj_kernel(%arg0: i32, %arg1: memref<64x128xf32, #tpu.memory_space<vmem>>, %arg2: memref<128x1536xf32, #tpu.memory_space<vmem>>, %arg3: memref<1x1536xf32, #tpu.memory_space<vmem>>, %arg4: memref<64x384xf32, #tpu.memory_space<vmem>>, %arg5: memref<64x384xf32, #tpu.memory_space<vmem>>, %arg6: memref<64x384xf32, #tpu.memory_space<vmem>>, %arg7: memref<64x384xf32, #tpu.memory_space<vmem>>) attributes {dimension_semantics = [#tpu.dimension_semantics<parallel>], iteration_bounds = array<i64: 1>, scalar_prefetch = 0 : i64, scratch_operands = 0 : i64, tpu.core_type = #tpu.core_type<tc>, window_params = [{transform_indices = @transform_0, window_bounds = array<i64: 64, 128>}, {pipeline_mode = #tpu.pipeline_mode<synchronous>, transform_indices = @transform_1, window_bounds = array<i64: 128, 1536>}, {pipeline_mode = #tpu.pipeline_mode<synchronous>, transform_indices = @transform_2, window_bounds = array<i64: 1, 1536>}, {transform_indices = @transform_3, window_bounds = array<i64: 64, 384>}, {transform_indices = @transform_4, window_bounds = array<i64: 64, 384>}, {transform_indices = @transform_5, window_bounds = array<i64: 64, 384>}, {transform_indices = @transform_6, window_bounds = array<i64: 64, 384>}]} {
    %c0 = arith.constant 0 : index
    %c0_0 = arith.constant 0 : index
    %0 = vector.load %arg1[%c0, %c0_0] : memref<64x128xf32, #tpu.memory_space<vmem>>, vector<64x128xf32>
    %c0_1 = arith.constant 0 : index
    %c0_2 = arith.constant 0 : index
    %1 = vector.load %arg2[%c0_1, %c0_2] : memref<128x1536xf32, #tpu.memory_space<vmem>>, vector<128x1536xf32>
    %cst = arith.constant dense<0.000000e+00> : vector<64x1536xf32>
    %2 = tpu.matmul %0, %1, %cst {dimension_numbers = #tpu.dot_dimension_numbers<[1], [0], [0], [1], [0, 0, 1, 1], [], []>} : vector<64x128xf32>, vector<128x1536xf32>, vector<64x1536xf32> -> vector<64x1536xf32>
    %c0_3 = arith.constant 0 : index
    %c0_4 = arith.constant 0 : index
    %3 = vector.load %arg3[%c0_3, %c0_4] : memref<1x1536xf32, #tpu.memory_space<vmem>>, vector<1x1536xf32>
    %4 = vector.broadcast %3 : vector<1x1536xf32> to vector<64x1536xf32>
    %5 = arith.addf %2, %4 : vector<64x1536xf32>
    %6 = vector.extract_strided_slice %5 {offsets = [0, 0], sizes = [64, 384], strides = [1, 1]} : vector<64x1536xf32> to vector<64x384xf32>
    %c0_5 = arith.constant 0 : index
    %c0_6 = arith.constant 0 : index
    %7 = vector.load %arg4[%c0_5, %c0_6] : memref<64x384xf32, #tpu.memory_space<vmem>>, vector<64x384xf32>
    tpu.vector_store %arg4[%c0_5, %c0_6], %6 {strides = array<i32>} : memref<64x384xf32, #tpu.memory_space<vmem>>, vector<64x384xf32>,
    %8 = vector.extract_strided_slice %5 {offsets = [0, 384], sizes = [64, 384], strides = [1, 1]} : vector<64x1536xf32> to vector<64x384xf32>
    %c0_7 = arith.constant 0 : index
    %c0_8 = arith.constant 0 : index
    %9 = vector.load %arg5[%c0_7, %c0_8] : memref<64x384xf32, #tpu.memory_space<vmem>>, vector<64x384xf32>
    tpu.vector_store %arg5[%c0_7, %c0_8], %8 {strides = array<i32>} : memref<64x384xf32, #tpu.memory_space<vmem>>, vector<64x384xf32>,
    %10 = vector.extract_strided_slice %5 {offsets = [0, 768], sizes = [64, 384], strides = [1, 1]} : vector<64x1536xf32> to vector<64x384xf32>
    %c0_9 = arith.constant 0 : index
    %c0_10 = arith.constant 0 : index
    %11 = vector.load %arg6[%c0_9, %c0_10] : memref<64x384xf32, #tpu.memory_space<vmem>>, vector<64x384xf32>
    tpu.vector_store %arg6[%c0_9, %c0_10], %10 {strides = array<i32>} : memref<64x384xf32, #tpu.memory_space<vmem>>, vector<64x384xf32>,
    %12 = vector.extract_strided_slice %5 {offsets = [0, 1152], sizes = [64, 384], strides = [1, 1]} : vector<64x1536xf32> to vector<64x384xf32>
    %c0_11 = arith.constant 0 : index
    %c0_12 = arith.constant 0 : index
    %13 = vector.load %arg7[%c0_11, %c0_12] : memref<64x384xf32, #tpu.memory_space<vmem>>, vector<64x384xf32>
    tpu.vector_store %arg7[%c0_11, %c0_12], %12 {strides = array<i32>} : memref<64x384xf32, #tpu.memory_space<vmem>>, vector<64x384xf32>,
    return
  }
  func.func @transform_0(%arg0: i32) -> (i32, i32) {
    %c0_i32 = arith.constant 0 : i32
    %c0_i32_0 = arith.constant 0 : i32
    return %arg0, %c0_i32 : i32, i32
  }
  func.func @transform_1(%arg0: i32) -> (i32, i32) {
    %c0_i32 = arith.constant 0 : i32
    %c0_i32_0 = arith.constant 0 : i32
    %c0_i32_1 = arith.constant 0 : i32
    return %c0_i32, %c0_i32_0 : i32, i32
  }
  func.func @transform_2(%arg0: i32) -> (i32, i32) {
    %c0_i32 = arith.constant 0 : i32
    %c0_i32_0 = arith.constant 0 : i32
    %c0_i32_1 = arith.constant 0 : i32
    return %c0_i32, %c0_i32_0 : i32, i32
  }
  func.func @transform_3(%arg0: i32) -> (i32, i32) {
    %c0_i32 = arith.constant 0 : i32
    %c0_i32_0 = arith.constant 0 : i32
    return %arg0, %c0_i32 : i32, i32
  }
  func.func @transform_4(%arg0: i32) -> (i32, i32) {
    %c0_i32 = arith.constant 0 : i32
    %c0_i32_0 = arith.constant 0 : i32
    return %arg0, %c0_i32 : i32, i32
  }
  func.func @transform_5(%arg0: i32) -> (i32, i32) {
    %c0_i32 = arith.constant 0 : i32
    %c0_i32_0 = arith.constant 0 : i32
    return %arg0, %c0_i32 : i32, i32
  }
  func.func @transform_6(%arg0: i32) -> (i32, i32) {
    %c0_i32 = arith.constant 0 : i32
    %c0_i32_0 = arith.constant 0 : i32
    return %arg0, %c0_i32 : i32, i32
  }
}

</mosaic_0001>

<bundles_post_ra>
// kernel: tpu_custom_call.1
= control target key start
LH: loop header
LB: loop body
LE: loop exit
PB: predicated region body
PF: predicated region fallthrough
CT: control target
= control target key end

     0   :  { %12 = vsyncpa [#allocation3], 0  ;;  %s1953_s0 = inlined_call_operand.hbm [shape: f32[64,128], index: 0, kind: input, shape index: {}]   ;;  %s1954_s1 = inlined_call_operand.hbm [shape: f32[128,1536], index: 1, kind: input, shape index: {}]   ;;  %s1955_s2 = inlined_call_operand.hbm [shape: f32[1,1536], index: 2, kind: input, shape index: {}]   ;;  %s1956_s3 = inlined_call_operand.hbm [shape: f32[64,384], index: 3, kind: output, shape index: {0}]   ;;  %s1957_s4 = inlined_call_operand.hbm [shape: f32[64,384], index: 4, kind: output, shape index: {1}]   ;;  %s1958_s5 = inlined_call_operand.hbm [shape: f32[64,384], index: 5, kind: output, shape index: {2}]   ;;  %s1959_s6 = inlined_call_operand.hbm [shape: f32[64,384], index: 6, kind: output, shape index: {3}]  }
   0x1   :  { %13 = vsyncpa [#allocation6], 0 }
   0x2   :  { %14 = vsyncpa [#allocation4], 0 }
   0x3   :  { %15 = vsyncpa [#allocation10], 0 }
   0x4   :  { %16 = vsyncpa [#allocation13], 0  ;;  %s1533_s21 = smov [#allocation5]   ;;  %s1369_s25 = scalar_lea.hbm %s1954_s1, 24576 }
   0x5   :  { %s34_s22 = sshll.u32 %s1533_s21, 4  ;;  %p1370_p0 = scmp.ne.s32.totalorder %s1954_s1, %s1369_s25  ;;  %s35_s22 = int_to_ptr.vmem [resolvable:$true] %s34_s22 }
   0x6   :  { %p1373_p1 = scmp.lt.u32.totalorder %s1369_s25, %s1954_s1 }
   0x8   :  { %p1375_p2 = pnand %p1373_p1, %p1370_p0 }
   0xa   :  { %1378 = shalt.err (!%p1375_p2)
}
   0xb   :  { %s1379_s30 = scalar_lea.vmem %s35_s22, 24576  ;;  %p1384_p4 = scmp.lt.s32.totalorder %s35_s22, %s35_s22 }
   0xc   :  { %p1380_p3 = scmp.ne.s32.totalorder %s35_s22, %s1379_s30  ;;  %p1385_p5 = scmp.lt.s32.totalorder %s1379_s30, %s1379_s30 }
   0xe   :  { %p1386_p6 = por %p1385_p5, %p1384_p4 }
  0x10   :  { %p1387_p7 = pnand %p1386_p6, %p1380_p3 }
  0x12   :  { %1390 = shalt.err (!%p1387_p7)
}
  0x13   :  { %s1534_s7 = smov 1536   ;;  %s1535_s8 = smov 96  }
  0x14   :  { %40 = dma.hbm_to_vmem [thread:$0]  %s1954_s1, 24576, %s35_s22, [#allocation6], %s1534_s7, %s1534_s7, %s1535_s8  }
  0x15   :  { %s1536_s11 = smov [#allocation2]   ;;  %s1391_s15 = scalar_lea.hbm %s1953_s0, 1024 }
  0x16   :  { %s22_s12 = sshll.u32 %s1536_s11, 4  ;;  %p1392_p8 = scmp.ne.s32.totalorder %s1953_s0, %s1391_s15  ;;  %s23_s12 = int_to_ptr.vmem [resolvable:$true] %s22_s12 }
  0x17   :  { %p1395_p9 = scmp.lt.u32.totalorder %s1391_s15, %s1953_s0 }
  0x19   :  { %p1397_p10 = pnand %p1395_p9, %p1392_p8 }
  0x1b   :  { %1400 = shalt.err (!%p1397_p10)
}
  0x1c   :  { %s1401_s20 = scalar_lea.vmem %s23_s12, 1024  ;;  %p1406_p12 = scmp.lt.s32.totalorder %s23_s12, %s23_s12 }
  0x1d   :  { %p1402_p11 = scmp.ne.s32.totalorder %s23_s12, %s1401_s20  ;;  %p1407_p13 = scmp.lt.s32.totalorder %s1401_s20, %s1401_s20 }
  0x1f   :  { %p1408_p0 = por %p1407_p13, %p1406_p12 }
  0x21   :  { %p1409_p1 = pnand %p1408_p0, %p1402_p11 }
  0x23   :  { %1412 = shalt.err (!%p1409_p1)
}
  0x24   :  { %s1537_s1 = smov 128   ;;  %s1538_s21 = smov 8  }
  0x25   :  { %28 = dma.hbm_to_vmem [thread:$0]  %s1953_s0, 1024, %s23_s12, [#allocation3], %s1537_s1, %s1537_s1, %s1538_s21  }
  0x26   :  { %s1539_s24 = smov [#allocation7]   ;;  %s1413_s28 = scalar_lea.hbm %s1955_s2, 192 }
  0x27   :  { %s47_s25 = sshll.u32 %s1539_s24, 4  ;;  %p1414_p2 = scmp.ne.s32.totalorder %s1955_s2, %s1413_s28  ;;  %s48_s25 = int_to_ptr.vmem [resolvable:$true] %s47_s25 }
  0x28   :  { %p1417_p3 = scmp.lt.u32.totalorder %s1413_s28, %s1955_s2 }
  0x2a   :  { %p1419_p4 = pnand %p1417_p3, %p1414_p2 }
  0x2c   :  { %1422 = shalt.err (!%p1419_p4)
}
  0x2d   :  { %s1423_s9 = scalar_lea.vmem %s48_s25, 192  ;;  %p1428_p6 = scmp.lt.s32.totalorder %s48_s25, %s48_s25 }
  0x2e   :  { %p1424_p5 = scmp.ne.s32.totalorder %s48_s25, %s1423_s9  ;;  %p1429_p7 = scmp.lt.s32.totalorder %s1423_s9, %s1423_s9 }
  0x30   :  { %p1430_p8 = por %p1429_p7, %p1428_p6 }
  0x32   :  { %p1431_p9 = pnand %p1430_p8, %p1424_p5 }
  0x34   :  { %1434 = shalt.err (!%p1431_p9)
}
  0x35   :  { %50 = dma.hbm_to_vmem [thread:$0]  %s1955_s2, 192, %s48_s25, [#allocation6]  }
  0x36   :  { %1523 = dma.done.wait [#allocation3], 1024  }
  0x37   :  { %1524 = vsyncadd [#allocation3], 4294966272 }
  0x38   :  { %1525 = dma.done.wait [#allocation6], 24768  }
  0x39   :  { %1526 = vsyncadd [#allocation6], 4294942528  ;;  %v1540_v0 = vmov 0.0   ;;  %v69_v1 = vld [vmem:[#allocation5 + $0x8] sm:$0xff]  ;;  %v71_v3 = vld [vmem:[#allocation5 + $0x18] sm:$0xff]  ;;  %s1541_s2 = smov [#allocation8]  }
  0x3a   :  { %388 = vmatprep.mubr.f32.mxu0 %v1540_v0  ;;  %501 = vmatprep.mubr.f32.mxu1 %v1540_v0  ;;  %v81_v2 = vld [vmem:[#allocation5 + $0x68] sm:$0xff]  ;;  %v83_v5 = vld [vmem:[#allocation5 + $0x78] sm:$0xff]  ;;  %v68_v6 = vld [vmem:[#allocation5] sm:$0xff]  ;;  %s1103_s11 = sshll.u32 %s1541_s2, 4  ;;  %s1104_s11 = int_to_ptr.vmem [resolvable:$true] %s1103_s11 }
  0x3b   :  { %v1163_v4 = vpack.c.bf16 %v81_v2, %v69_v1  ;;  %v80_v7 = vld [vmem:[#allocation5 + $0x60] sm:$0xff]  ;;  %v1195_v8 = vpack.c.bf16 %v83_v5, %v71_v3  ;;  %v70_v10 = vld [vmem:[#allocation5 + $0x10] sm:$0xff]  ;;  %v93_v12 = vld [vmem:[#allocation5 + $0xc8] sm:$0xff]  ;;  %s1435_s12 = scalar_lea.vmem %s1104_s11, 3072  ;;  %p1440_p11 = scmp.lt.s32.totalorder %s1104_s11, %s1104_s11 }
  0x3c   :  { %v1165_v9 = vpack.c.bf16 %v80_v7, %v68_v6  ;;  %v82_v11 = vld [vmem:[#allocation5 + $0x70] sm:$0xff]  ;;  %v105_v14 = vld [vmem:[#allocation5 + $0x128] sm:$0xff]  ;;  %v95_v15 = vld [vmem:[#allocation5 + $0xd8] sm:$0xff]  ;;  %p1436_p10 = scmp.ne.s32.totalorder %s1104_s11, %s1435_s12  ;;  %p1441_p12 = scmp.lt.s32.totalorder %s1435_s12, %s1435_s12 }
  0x3d   :  { %1164 = vmatprep.subr.bf16.mxu0 %v1163_v4  ;;  %v1197_v13 = vpack.c.bf16 %v82_v11, %v70_v10  ;;  %v107_v16 = vld [vmem:[#allocation5 + $0x138] sm:$0xff]  ;;  %1196 = vmatprep.subr.bf16.mxu1 %v1195_v8  ;;  %v1167_v17 = vpack.c.bf16 %v105_v14, %v93_v12  ;;  %v92_v19 = vld [vmem:[#allocation5 + $0xc0] sm:$0xff]  ;;  %v94_v21 = vld [vmem:[#allocation5 + $0xd0] sm:$0xff] }
  0x3e   :  { %1166 = vmatpush1.bf16.msra.mxu0 %v1165_v9  ;;  %v1199_v18 = vpack.c.bf16 %v107_v16, %v95_v15  ;;  %v104_v20 = vld [vmem:[#allocation5 + $0x120] sm:$0xff]  ;;  %v106_v23 = vld [vmem:[#allocation5 + $0x130] sm:$0xff]  ;;  %v117_v24 = vld [vmem:[#allocation5 + $0x188] sm:$0xff]  ;;  %p1442_p13 = por %p1441_p12, %p1440_p11 }
  0x3f   :  { %1198 = vmatpush1.bf16.msra.mxu1 %v1197_v13  ;;  %v1169_v22 = vpack.c.bf16 %v104_v20, %v92_v19  ;;  %v129_v25 = vld [vmem:[#allocation5 + $0x1e8] sm:$0xff]  ;;  %1168 = vmatprep.subr.bf16.mxu0 %v1167_v17  ;;  %v1201_v26 = vpack.c.bf16 %v106_v23, %v94_v21  ;;  %v119_v28 = vld [vmem:[#allocation5 + $0x198] sm:$0xff]  ;;  %v116_v30 = vld [vmem:[#allocation5 + $0x180] sm:$0xff] }
  0x40   :  { %1200 = vmatprep.subr.bf16.mxu1 %v1199_v18  ;;  %v1171_v27 = vpack.c.bf16 %v129_v25, %v117_v24  ;;  %v131_v29 = vld [vmem:[#allocation5 + $0x1f8] sm:$0xff]  ;;  %v128_v32 = vld [vmem:[#allocation5 + $0x1e0] sm:$0xff]  ;;  %v118_v33 = vld [vmem:[#allocation5 + $0x190] sm:$0xff]  ;;  %p1443_p0 = pnand %p1442_p13, %p1436_p10 }
  0x41   :  { %v1203_v31 = vpack.c.bf16 %v131_v29, %v119_v28  ;;  %v130_v34 = vld [vmem:[#allocation5 + $0x1f0] sm:$0xff]  ;;  %v1173_v35 = vpack.c.bf16 %v128_v32, %v116_v30  ;;  %v141_v36 = vld [vmem:[#allocation5 + $0x248] sm:$0xff]  ;;  %v143_v38 = vld [vmem:[#allocation5 + $0x258] sm:$0xff] }
  0x42   :  { %1170 = vmatpush1.bf16.msra.mxu0 %v1169_v22  ;;  %v153_v37 = vld [vmem:[#allocation5 + $0x2a8] sm:$0xff]  ;;  %v1205_v39 = vpack.c.bf16 %v130_v34, %v118_v33  ;;  %v155_v41 = vld [vmem:[#allocation5 + $0x2b8] sm:$0xff]  ;;  %v140_v42 = vld [vmem:[#allocation5 + $0x240] sm:$0xff] }
  0x43   :  { %1202 = vmatpush1.bf16.msra.mxu1 %v1201_v26  ;;  %1172 = vmatprep.subr.bf16.mxu0 %v1171_v27  ;;  %v1175_v40 = vpack.c.bf16 %v153_v37, %v141_v36  ;;  %v152_v43 = vld [vmem:[#allocation5 + $0x2a0] sm:$0xff]  ;;  %v1207_v44 = vpack.c.bf16 %v155_v41, %v143_v38  ;;  %v142_v45 = vld [vmem:[#allocation5 + $0x250] sm:$0xff]  ;;  %v165_v47 = vld [vmem:[#allocation5 + $0x308] sm:$0xff] }
  0x44   :  { %1204 = vmatprep.subr.bf16.mxu1 %v1203_v31  ;;  %v154_v46 = vld [vmem:[#allocation5 + $0x2b0] sm:$0xff]  ;;  %v177_v48 = vld [vmem:[#allocation5 + $0x368] sm:$0xff]  ;;  %v167_v49 = vld [vmem:[#allocation5 + $0x318] sm:$0xff]  ;;  %v1177_v51 = vpack.c.bf16 %v152_v43, %v140_v42 }
  0x45   :  { %v179_v50 = vld [vmem:[#allocation5 + $0x378] sm:$0xff]  ;;  %v1209_v52 = vpack.c.bf16 %v154_v46, %v142_v45  ;;  %v1179_v53 = vpack.c.bf16 %v177_v48, %v165_v47  ;;  %v164_v54 = vld [vmem:[#allocation5 + $0x300] sm:$0xff]  ;;  %v166_v56 = vld [vmem:[#allocation5 + $0x310] sm:$0xff] }
  0x46   :  { %1174 = vmatpush1.bf16.msra.mxu0 %v1173_v35  ;;  %v176_v55 = vld [vmem:[#allocation5 + $0x360] sm:$0xff]  ;;  %v1211_v57 = vpack.c.bf16 %v179_v50, %v167_v49  ;;  %v178_v58 = vld [vmem:[#allocation5 + $0x370] sm:$0xff]  ;;  %v189_v59 = vld [vmem:[#allocation5 + $0x3c8] sm:$0xff] }
  0x47   :  { %1206 = vmatpush1.bf16.msra.mxu1 %v1205_v39  ;;  %1176 = vmatprep.subr.bf16.mxu0 %v1175_v40  ;;  %v201_v60 = vld [vmem:[#allocation5 + $0x428] sm:$0xff]  ;;  %v191_v61 = vld [vmem:[#allocation5 + $0x3d8] sm:$0xff]  ;;  %v1181_v63 = vpack.c.bf16 %v176_v55, %v164_v54  ;;  %v1213_v1 = vpack.c.bf16 %v178_v58, %v166_v56  ;;  %v188_v3 = vld [vmem:[#allocation5 + $0x3c0] sm:$0xff] }
  0x48   :  { %1208 = vmatprep.subr.bf16.mxu1 %v1207_v44  ;;  %v203_v62 = vld [vmem:[#allocation5 + $0x438] sm:$0xff]  ;;  %v1183_v2 = vpack.c.bf16 %v201_v60, %v189_v59  ;;  %v200_v4 = vld [vmem:[#allocation5 + $0x420] sm:$0xff]  ;;  %v190_v5 = vld [vmem:[#allocation5 + $0x3d0] sm:$0xff] }
  0x49   :  { %v1215_v6 = vpack.c.bf16 %v203_v62, %v191_v61  ;;  %v202_v7 = vld [vmem:[#allocation5 + $0x430] sm:$0xff]  ;;  %v213_v8 = vld [vmem:[#allocation5 + $0x488] sm:$0xff]  ;;  %v215_v10 = vld [vmem:[#allocation5 + $0x498] sm:$0xff]  ;;  %v1185_v12 = vpack.c.bf16 %v200_v4, %v188_v3 }
  0x4a   :  { %1178 = vmatpush1.bf16.msra.mxu0 %v1177_v51  ;;  %v225_v9 = vld [vmem:[#allocation5 + $0x4e8] sm:$0xff]  ;;  %v227_v11 = vld [vmem:[#allocation5 + $0x4f8] sm:$0xff]  ;;  %v1217_v13 = vpack.c.bf16 %v202_v7, %v190_v5  ;;  %v212_v15 = vld [vmem:[#allocation5 + $0x480] sm:$0xff] }
  0x4b   :  { %1210 = vmatpush1.bf16.msra.mxu1 %v1209_v52  ;;  %1180 = vmatprep.subr.bf16.mxu0 %v1179_v53  ;;  %v1187_v14 = vpack.c.bf16 %v225_v9, %v213_v8  ;;  %v224_v16 = vld [vmem:[#allocation5 + $0x4e0] sm:$0xff]  ;;  %v214_v17 = vld [vmem:[#allocation5 + $0x490] sm:$0xff]  ;;  %v1219_v18 = vpack.c.bf16 %v227_v11, %v215_v10  ;;  %v237_v20 = vld [vmem:[#allocation5 + $0x548] sm:$0xff] }
  0x4c   :  { %1212 = vmatprep.subr.bf16.mxu1 %v1211_v57  ;;  %v226_v19 = vld [vmem:[#allocation5 + $0x4f0] sm:$0xff]  ;;  %v249_v21 = vld [vmem:[#allocation5 + $0x5a8] sm:$0xff]  ;;  %v239_v22 = vld [vmem:[#allocation5 + $0x558] sm:$0xff]  ;;  %v1189_v24 = vpack.c.bf16 %v224_v16, %v212_v15 }
  0x4d   :  { %v251_v23 = vld [vmem:[#allocation5 + $0x5b8] sm:$0xff]  ;;  %v1221_v25 = vpack.c.bf16 %v226_v19, %v214_v17  ;;  %v1191_v26 = vpack.c.bf16 %v249_v21, %v237_v20  ;;  %v236_v27 = vld [vmem:[#allocation5 + $0x540] sm:$0xff]  ;;  %v238_v29 = vld [vmem:[#allocation5 + $0x550] sm:$0xff] }
  0x4e   :  { %1182 = vmatpush1.bf16.msra.mxu0 %v1181_v63  ;;  %v248_v28 = vld [vmem:[#allocation5 + $0x5a0] sm:$0xff]  ;;  %v1223_v30 = vpack.c.bf16 %v251_v23, %v239_v22  ;;  %v250_v31 = vld [vmem:[#allocation5 + $0x5b0] sm:$0xff]  ;;  %v73_v32 = vld [vmem:[#allocation5 + $0x28] sm:$0xff] }
  0x4f   :  { %1214 = vmatpush1.bf16.msra.mxu1 %v1213_v1  ;;  %1184 = vmatprep.subr.bf16.mxu0 %v1183_v2  ;;  %v85_v33 = vld [vmem:[#allocation5 + $0x88] sm:$0xff]  ;;  %v75_v34 = vld [vmem:[#allocation5 + $0x38] sm:$0xff]  ;;  %v1193_v36 = vpack.c.bf16 %v248_v28, %v236_v27  ;;  %v1225_v37 = vpack.c.bf16 %v250_v31, %v238_v29  ;;  %v72_v39 = vld [vmem:[#allocation5 + $0x20] sm:$0xff] }
  0x50   :  { %1216 = vmatprep.subr.bf16.mxu1 %v1215_v6  ;;  %v87_v35 = vld [vmem:[#allocation5 + $0x98] sm:$0xff]  ;;  %v1227_v38 = vpack.c.bf16 %v85_v33, %v73_v32  ;;  %v84_v40 = vld [vmem:[#allocation5 + $0x80] sm:$0xff]  ;;  %v74_v42 = vld [vmem:[#allocation5 + $0x30] sm:$0xff] }
  0x51   :  { %v1259_v41 = vpack.c.bf16 %v87_v35, %v75_v34  ;;  %v86_v43 = vld [vmem:[#allocation5 + $0x90] sm:$0xff]  ;;  %v97_v44 = vld [vmem:[#allocation5 + $0xe8] sm:$0xff]  ;;  %v1620_v46 = vld [vmem:[#allocation2] sm:$0xff]  ;;  %v1229_v47 = vpack.c.bf16 %v84_v40, %v72_v39 }
  0x52   :  { %1186 = vmatpush1.bf16.msra.mxu0 %v1185_v12  ;;  %v109_v45 = vld [vmem:[#allocation5 + $0x148] sm:$0xff]  ;;  %v99_v48 = vld [vmem:[#allocation5 + $0xf8] sm:$0xff]  ;;  %v1261_v50 = vpack.c.bf16 %v86_v43, %v74_v42  ;;  %v96_v51 = vld [vmem:[#allocation5 + $0xe0] sm:$0xff] }
  0x53   :  { %1218 = vmatpush1.bf16.msra.mxu1 %v1217_v13  ;;  %1188 = vmatprep.subr.bf16.mxu0 %v1187_v14  ;;  %v111_v49 = vld [vmem:[#allocation5 + $0x158] sm:$0xff]  ;;  %v108_v52 = vld [vmem:[#allocation5 + $0x140] sm:$0xff]  ;;  %v1231_v53 = vpack.c.bf16 %v109_v45, %v97_v44  ;;  %v98_v54 = vld [vmem:[#allocation5 + $0xf0] sm:$0xff] }
  0x54   :  { %1220 = vmatprep.subr.bf16.mxu1 %v1219_v18  ;;  %v110_v55 = vld [vmem:[#allocation5 + $0x150] sm:$0xff]  ;;  %v1263_v56 = vpack.c.bf16 %v111_v49, %v99_v48  ;;  %v121_v57 = vld [vmem:[#allocation5 + $0x1a8] sm:$0xff]  ;;  %v1233_v60 = vpack.c.bf16 %v108_v52, %v96_v51  ;;  %v123_v61 = vld [vmem:[#allocation5 + $0x1b8] sm:$0xff] }
  0x55   :  { %v133_v58 = vld [vmem:[#allocation5 + $0x208] sm:$0xff]  ;;  %v135_v62 = vld [vmem:[#allocation5 + $0x218] sm:$0xff]  ;;  %v1265_v63 = vpack.c.bf16 %v110_v55, %v98_v54  ;;  %v120_v1 = vld [vmem:[#allocation5 + $0x1a0] sm:$0xff] }
  0x56   :  { %1190 = vmatpush1.bf16.msra.mxu0 %v1189_v24  ;;  %v1624_v59 = vld [vmem:[#allocation2 + $0x8] sm:$0xff]  ;;  %v132_v2 = vld [vmem:[#allocation5 + $0x200] sm:$0xff]  ;;  %v1235_v3 = vpack.c.bf16 %v133_v58, %v121_v57  ;;  %v122_v4 = vld [vmem:[#allocation5 + $0x1b0] sm:$0xff]  ;;  %v1267_v6 = vpack.c.bf16 %v135_v62, %v123_v61 }
  0x57   :  { %1222 = vmatpush1.bf16.msra.mxu1 %v1221_v25  ;;  %1192 = vmatprep.subr.bf16.mxu0 %v1191_v26  ;;  %v134_v5 = vld [vmem:[#allocation5 + $0x210] sm:$0xff]  ;;  %v145_v7 = vld [vmem:[#allocation5 + $0x268] sm:$0xff]  ;;  %v1237_v10 = vpack.c.bf16 %v132_v2, %v120_v1  ;;  %v147_v11 = vld [vmem:[#allocation5 + $0x278] sm:$0xff] }
  0x58   :  { %1224 = vmatprep.subr.bf16.mxu1 %v1223_v30  ;;  %v157_v8 = vld [vmem:[#allocation5 + $0x2c8] sm:$0xff]  ;;  %v1630_v9 = vld [vmem:[#allocation2 + $0x10] sm:$0xff]  ;;  %v159_v12 = vld [vmem:[#allocation5 + $0x2d8] sm:$0xff]  ;;  %v1269_v13 = vpack.c.bf16 %v134_v5, %v122_v4 }
  0x59   :  { %v144_v14 = vld [vmem:[#allocation5 + $0x260] sm:$0xff]  ;;  %v1239_v16 = vpack.c.bf16 %v157_v8, %v145_v7  ;;  %v146_v17 = vld [vmem:[#allocation5 + $0x270] sm:$0xff]  ;;  %v1271_v19 = vpack.c.bf16 %v159_v12, %v147_v11  ;;  %v169_v20 = vld [vmem:[#allocation5 + $0x328] sm:$0xff] }
  0x5a   :  { %1194 = vmatpush1.bf16.msra.mxu0 %v1193_v36  ;;  %v156_v15 = vld [vmem:[#allocation5 + $0x2c0] sm:$0xff]  ;;  %v158_v18 = vld [vmem:[#allocation5 + $0x2d0] sm:$0xff]  ;;  %v181_v21 = vld [vmem:[#allocation5 + $0x388] sm:$0xff] }
  0x5b   :  { %1226 = vmatpush1.bf16.msra.mxu1 %v1225_v37  ;;  %1228 = vmatprep.subr.bf16.mxu0 %v1227_v38  ;;  %v1636_v22 = vld [vmem:[#allocation2 + $0x18] sm:$0xff]  ;;  %v1241_v23 = vpack.c.bf16 %v156_v15, %v144_v14  ;;  %v1273_v26 = vpack.c.bf16 %v158_v18, %v146_v17  ;;  %v168_v27 = vld [vmem:[#allocation5 + $0x320] sm:$0xff]  ;;  %v1243_v29 = vpack.c.bf16 %v181_v21, %v169_v20  ;;  %v170_v30 = vld [vmem:[#allocation5 + $0x330] sm:$0xff] }
  0x5c   :  { %1260 = vmatprep.subr.bf16.mxu1 %v1259_v41  ;;  %v171_v24 = vld [vmem:[#allocation5 + $0x338] sm:$0xff]  ;;  %v180_v28 = vld [vmem:[#allocation5 + $0x380] sm:$0xff]  ;;  %v182_v31 = vld [vmem:[#allocation5 + $0x390] sm:$0xff] }
  0x5d   :  { %389 = vmatmul.mubr.f32.vlgmr.msra.gmra.mrb[0].mxu0 %v1620_v46  ;;  %v183_v25 = vld [vmem:[#allocation5 + $0x398] sm:$0xff]  ;;  %v193_v33 = vld [vmem:[#allocation5 + $0x3e8] sm:$0xff]  ;;  %v1642_v35 = vld [vmem:[#allocation2 + $0x20] sm:$0xff]  ;;  %v1245_v36 = vpack.c.bf16 %v180_v28, %v168_v27  ;;  %v1277_v39 = vpack.c.bf16 %v182_v31, %v170_v30 }
  0x5e   :  { %502 = vmatmul.mubr.f32.vlgmr.msra.gmra.mrb[0].mxu1 %v1620_v46  ;;  %1230 = vmatpush1.bf16.msra.mxu0 %v1229_v47  ;;  %v1275_v32 = vpack.c.bf16 %v183_v25, %v171_v24  ;;  %v205_v34 = vld [vmem:[#allocation5 + $0x448] sm:$0xff]  ;;  %v195_v37 = vld [vmem:[#allocation5 + $0x3f8] sm:$0xff]  ;;  %v192_v40 = vld [vmem:[#allocation5 + $0x3e0] sm:$0xff] }
  0x5f   :  { %1262 = vmatpush1.bf16.msra.mxu1 %v1261_v50  ;;  %394 = vmatprep.mubr.f32.mxu0 %v1540_v0  ;;  %v207_v38 = vld [vmem:[#allocation5 + $0x458] sm:$0xff]  ;;  %v204_v41 = vld [vmem:[#allocation5 + $0x440] sm:$0xff]  ;;  %v1247_v42 = vpack.c.bf16 %v205_v34, %v193_v33  ;;  %v194_v43 = vld [vmem:[#allocation5 + $0x3f0] sm:$0xff] }
  0x60   :  { %507 = vmatprep.mubr.f32.mxu1 %v1540_v0  ;;  %1232 = vmatprep.subr.bf16.mxu0 %v1231_v53  ;;  %v206_v44 = vld [vmem:[#allocation5 + $0x450] sm:$0xff]  ;;  %v1279_v45 = vpack.c.bf16 %v207_v38, %v195_v37  ;;  %v217_v47 = vld [vmem:[#allocation5 + $0x4a8] sm:$0xff]  ;;  %v1249_v50 = vpack.c.bf16 %v204_v41, %v192_v40  ;;  %v219_v51 = vld [vmem:[#allocation5 + $0x4b8] sm:$0xff] }
  0x61   :  { %395 = vmatmul.mubr.f32.gmra.mrb[2].mxu0 %v1624_v59  ;;  %1264 = vmatprep.subr.bf16.mxu1 %v1263_v56  ;;  %v229_v48 = vld [vmem:[#allocation5 + $0x508] sm:$0xff]  ;;  %v231_v52 = vld [vmem:[#allocation5 + $0x518] sm:$0xff]  ;;  %v1281_v53 = vpack.c.bf16 %v206_v44, %v194_v43  ;;  %v216_v54 = vld [vmem:[#allocation5 + $0x4a0] sm:$0xff] }
  0x62   :  { %508 = vmatmul.mubr.f32.gmra.mrb[2].mxu1 %v1624_v59  ;;  %1234 = vmatpush1.bf16.msra.mxu0 %v1233_v60  ;;  %v1648_v49 = vld [vmem:[#allocation2 + $0x28] sm:$0xff]  ;;  %v228_v55 = vld [vmem:[#allocation5 + $0x500] sm:$0xff]  ;;  %v1251_v56 = vpack.c.bf16 %v229_v48, %v217_v47  ;;  %v218_v57 = vld [vmem:[#allocation5 + $0x4b0] sm:$0xff]  ;;  %v1283_v60 = vpack.c.bf16 %v231_v52, %v219_v51 }
  0x63   :  { %1266 = vmatpush1.bf16.msra.mxu1 %v1265_v63  ;;  %400 = vmatprep.mubr.f32.mxu0 %v1540_v0  ;;  %v230_v58 = vld [vmem:[#allocation5 + $0x510] sm:$0xff]  ;;  %v241_v61 = vld [vmem:[#allocation5 + $0x568] sm:$0xff]  ;;  %v1253_v1 = vpack.c.bf16 %v228_v55, %v216_v54  ;;  %v243_v2 = vld [vmem:[#allocation5 + $0x578] sm:$0xff] }
  0x64   :  { %513 = vmatprep.mubr.f32.mxu1 %v1540_v0  ;;  %1236 = vmatprep.subr.bf16.mxu0 %v1235_v3  ;;  %v253_v62 = vld [vmem:[#allocation5 + $0x5c8] sm:$0xff]  ;;  %v1654_v63 = vld [vmem:[#allocation2 + $0x30] sm:$0xff]  ;;  %v255_v3 = vld [vmem:[#allocation5 + $0x5d8] sm:$0xff]  ;;  %v1285_v4 = vpack.c.bf16 %v230_v58, %v218_v57 }
  0x65   :  { %401 = vmatmul.mubr.f32.gmra.mrb[4].mxu0 %v1630_v9  ;;  %1268 = vmatprep.subr.bf16.mxu1 %v1267_v6  ;;  %v240_v5 = vld [vmem:[#allocation5 + $0x560] sm:$0xff]  ;;  %v1255_v7 = vpack.c.bf16 %v253_v62, %v241_v61  ;;  %v242_v8 = vld [vmem:[#allocation5 + $0x570] sm:$0xff]  ;;  %v1287_v11 = vpack.c.bf16 %v255_v3, %v243_v2  ;;  %v77_v12 = vld [vmem:[#allocation5 + $0x48] sm:$0xff] }
  0x66   :  { %514 = vmatmul.mubr.f32.gmra.mrb[4].mxu1 %v1630_v9  ;;  %1238 = vmatpush1.bf16.msra.mxu0 %v1237_v10  ;;  %v252_v6 = vld [vmem:[#allocation5 + $0x5c0] sm:$0xff]  ;;  %v254_v10 = vld [vmem:[#allocation5 + $0x5d0] sm:$0xff]  ;;  %v1660_v14 = vld [vmem:[#allocation2 + $0x38] sm:$0xff] }
  0x67   :  { %1270 = vmatpush1.bf16.msra.mxu1 %v1269_v13  ;;  %406 = vmatprep.mubr.f32.mxu0 %v1540_v0  ;;  %v89_v13 = vld [vmem:[#allocation5 + $0xa8] sm:$0xff]  ;;  %v1257_v15 = vpack.c.bf16 %v252_v6, %v240_v5  ;;  %v91_v17 = vld [vmem:[#allocation5 + $0xb8] sm:$0xff]  ;;  %v1289_v18 = vpack.c.bf16 %v254_v10, %v242_v8  ;;  %v88_v20 = vld [vmem:[#allocation5 + $0xa0] sm:$0xff] }
  0x68   :  { %519 = vmatprep.mubr.f32.mxu1 %v1540_v0  ;;  %1240 = vmatprep.subr.bf16.mxu0 %v1239_v16  ;;  %v79_v16 = vld [vmem:[#allocation5 + $0x58] sm:$0xff]  ;;  %v1291_v21 = vpack.c.bf16 %v89_v13, %v77_v12  ;;  %v90_v24 = vld [vmem:[#allocation5 + $0xb0] sm:$0xff]  ;;  %v113_v27 = vld [vmem:[#allocation5 + $0x168] sm:$0xff] }
  0x69   :  { %407 = vmatmul.mubr.f32.gmra.mrb[6].mxu0 %v1636_v22  ;;  %1272 = vmatprep.subr.bf16.mxu1 %v1271_v19  ;;  %v76_v19 = vld [vmem:[#allocation5 + $0x40] sm:$0xff]  ;;  %v1323_v25 = vpack.c.bf16 %v91_v17, %v79_v16  ;;  %v115_v30 = vld [vmem:[#allocation5 + $0x178] sm:$0xff]  ;;  %v114_v37 = vld [vmem:[#allocation5 + $0x170] sm:$0xff] }
  0x6a   :  { %520 = vmatmul.mubr.f32.gmra.mrb[6].mxu1 %v1636_v22  ;;  %1242 = vmatpush1.bf16.msra.mxu0 %v1241_v23  ;;  %v78_v23 = vld [vmem:[#allocation5 + $0x50] sm:$0xff]  ;;  %v1293_v28 = vpack.c.bf16 %v88_v20, %v76_v19  ;;  %v112_v33 = vld [vmem:[#allocation5 + $0x160] sm:$0xff]  ;;  %v137_v40 = vld [vmem:[#allocation5 + $0x228] sm:$0xff] }
  0x6b   :  { %1274 = vmatpush1.bf16.msra.mxu1 %v1273_v26  ;;  %412 = vmatprep.mubr.f32.mxu0 %v1540_v0  ;;  %v101_v26 = vld [vmem:[#allocation5 + $0x108] sm:$0xff]  ;;  %v1325_v31 = vpack.c.bf16 %v90_v24, %v78_v23  ;;  %v139_v43 = vld [vmem:[#allocation5 + $0x238] sm:$0xff]  ;;  %v136_v47 = vld [vmem:[#allocation5 + $0x220] sm:$0xff] }
  0x6c   :  { %525 = vmatprep.mubr.f32.mxu1 %v1540_v0  ;;  %1244 = vmatprep.subr.bf16.mxu0 %v1243_v29  ;;  %v103_v29 = vld [vmem:[#allocation5 + $0x118] sm:$0xff]  ;;  %v1295_v34 = vpack.c.bf16 %v113_v27, %v101_v26  ;;  %v138_v51 = vld [vmem:[#allocation5 + $0x230] sm:$0xff]  ;;  %v161_v54 = vld [vmem:[#allocation5 + $0x2e8] sm:$0xff] }
  0x6d   :  { %413 = vmatmul.mubr.f32.gmra.mrb[8].mxu0 %v1642_v35  ;;  %1276 = vmatprep.subr.bf16.mxu1 %v1275_v32  ;;  %v100_v32 = vld [vmem:[#allocation5 + $0x100] sm:$0xff]  ;;  %v1327_v38 = vpack.c.bf16 %v115_v30, %v103_v29  ;;  %v163_v57 = vld [vmem:[#allocation5 + $0x2f8] sm:$0xff]  ;;  %v162_v2 = vld [vmem:[#allocation5 + $0x2f0] sm:$0xff] }
  0x6e   :  { %526 = vmatmul.mubr.f32.gmra.mrb[8].mxu1 %v1642_v35  ;;  %1246 = vmatpush1.bf16.msra.mxu0 %v1245_v36  ;;  %v102_v36 = vld [vmem:[#allocation5 + $0x110] sm:$0xff]  ;;  %v1297_v41 = vpack.c.bf16 %v112_v33, %v100_v32  ;;  %v160_v61 = vld [vmem:[#allocation5 + $0x2e0] sm:$0xff]  ;;  %v185_v5 = vld [vmem:[#allocation5 + $0x3a8] sm:$0xff] }
  0x6f   :  { %1278 = vmatpush1.bf16.msra.mxu1 %v1277_v39  ;;  %418 = vmatprep.mubr.f32.mxu0 %v1540_v0  ;;  %v125_v39 = vld [vmem:[#allocation5 + $0x1c8] sm:$0xff]  ;;  %v1329_v44 = vpack.c.bf16 %v114_v37, %v102_v36  ;;  %v187_v8 = vld [vmem:[#allocation5 + $0x3b8] sm:$0xff]  ;;  %v184_v12 = vld [vmem:[#allocation5 + $0x3a0] sm:$0xff] }
  0x70   :  { %531 = vmatprep.mubr.f32.mxu1 %v1540_v0  ;;  %1248 = vmatprep.subr.bf16.mxu0 %v1247_v42  ;;  %v127_v42 = vld [vmem:[#allocation5 + $0x1d8] sm:$0xff]  ;;  %v1299_v48 = vpack.c.bf16 %v137_v40, %v125_v39  ;;  %v186_v16 = vld [vmem:[#allocation5 + $0x3b0] sm:$0xff]  ;;  %v209_v19 = vld [vmem:[#allocation5 + $0x468] sm:$0xff] }
  0x71   :  { %419 = vmatmul.mubr.f32.gmra.mrb[10].mxu0 %v1648_v49  ;;  %1280 = vmatprep.subr.bf16.mxu1 %v1279_v45  ;;  %v124_v45 = vld [vmem:[#allocation5 + $0x1c0] sm:$0xff]  ;;  %v1331_v52 = vpack.c.bf16 %v139_v43, %v127_v42  ;;  %v211_v23 = vld [vmem:[#allocation5 + $0x478] sm:$0xff]  ;;  %v210_v29 = vld [vmem:[#allocation5 + $0x470] sm:$0xff] }
  0x72   :  { %532 = vmatmul.mubr.f32.gmra.mrb[10].mxu1 %v1648_v49  ;;  %1250 = vmatpush1.bf16.msra.mxu0 %v1249_v50  ;;  %v126_v50 = vld [vmem:[#allocation5 + $0x1d0] sm:$0xff]  ;;  %v1301_v55 = vpack.c.bf16 %v136_v47, %v124_v45  ;;  %v208_v26 = vld [vmem:[#allocation5 + $0x460] sm:$0xff]  ;;  %v233_v32 = vld [vmem:[#allocation5 + $0x528] sm:$0xff] }
  0x73   :  { %1282 = vmatpush1.bf16.msra.mxu1 %v1281_v53  ;;  %424 = vmatprep.mubr.f32.mxu0 %v1540_v0  ;;  %v149_v53 = vld [vmem:[#allocation5 + $0x288] sm:$0xff]  ;;  %v1333_v58 = vpack.c.bf16 %v138_v51, %v126_v50  ;;  %v235_v36 = vld [vmem:[#allocation5 + $0x538] sm:$0xff]  ;;  %v232_v39 = vld [vmem:[#allocation5 + $0x520] sm:$0xff] }
  0x74   :  { %537 = vmatprep.mubr.f32.mxu1 %v1540_v0  ;;  %1252 = vmatprep.subr.bf16.mxu0 %v1251_v56  ;;  %v151_v56 = vld [vmem:[#allocation5 + $0x298] sm:$0xff]  ;;  %v1303_v62 = vpack.c.bf16 %v161_v54, %v149_v53  ;;  %v234_v42 = vld [vmem:[#allocation5 + $0x530] sm:$0xff]  ;;  %v257_v45 = vld [vmem:[#allocation5 + $0x5e8] sm:$0xff] }
  0x75   :  { %425 = vmatmul.mubr.f32.gmra.mrb[12].mxu0 %v1654_v63  ;;  %1284 = vmatprep.subr.bf16.mxu1 %v1283_v60  ;;  %v148_v60 = vld [vmem:[#allocation5 + $0x280] sm:$0xff]  ;;  %v1335_v3 = vpack.c.bf16 %v163_v57, %v151_v56  ;;  %v259_v50 = vld [vmem:[#allocation5 + $0x5f8] sm:$0xff]  ;;  %v258_v56 = vld [vmem:[#allocation5 + $0x5f0] sm:$0xff] }
  0x76   :  { %538 = vmatmul.mubr.f32.gmra.mrb[12].mxu1 %v1654_v63  ;;  %1254 = vmatpush1.bf16.msra.mxu0 %v1253_v1  ;;  %v150_v1 = vld [vmem:[#allocation5 + $0x290] sm:$0xff]  ;;  %v1305_v6 = vpack.c.bf16 %v160_v61, %v148_v60  ;;  %v256_v53 = vld [vmem:[#allocation5 + $0x5e0] sm:$0xff] }
  0x77   :  { %1286 = vmatpush1.bf16.msra.mxu1 %v1285_v4  ;;  %430 = vmatprep.mubr.f32.mxu0 %v1540_v0  ;;  %v173_v4 = vld [vmem:[#allocation5 + $0x348] sm:$0xff]  ;;  %v1337_v10 = vpack.c.bf16 %v162_v2, %v150_v1 }
  0x78   :  { %543 = vmatprep.mubr.f32.mxu1 %v1540_v0  ;;  %1256 = vmatprep.subr.bf16.mxu0 %v1255_v7  ;;  %v175_v7 = vld [vmem:[#allocation5 + $0x358] sm:$0xff]  ;;  %v1307_v13 = vpack.c.bf16 %v185_v5, %v173_v4 }
  0x79   :  { %431 = vmatmul.mubr.f32.gmra.mrb[14].mxu0 %v1660_v14  ;;  %1288 = vmatprep.subr.bf16.mxu1 %v1287_v11  ;;  %v172_v11 = vld [vmem:[#allocation5 + $0x340] sm:$0xff]  ;;  %v1339_v17 = vpack.c.bf16 %v187_v8, %v175_v7 }
  0x7a   :  { %544 = vmatmul.mubr.f32.gmra.mrb[14].mxu1 %v1660_v14  ;;  %1258 = vmatpush1.bf16.msra.mxu0 %v1257_v15  ;;  %v174_v15 = vld [vmem:[#allocation5 + $0x350] sm:$0xff]  ;;  %v1309_v20 = vpack.c.bf16 %v184_v12, %v172_v11 }
  0x7b   :  { %1290 = vmatpush1.bf16.msra.mxu1 %v1289_v18  ;;  %614 = vmatprep.mubr.f32.mxu0 %v1540_v0  ;;  %v197_v18 = vld [vmem:[#allocation5 + $0x408] sm:$0xff]  ;;  %v1341_v24 = vpack.c.bf16 %v186_v16, %v174_v15 }
  0x7c   :  { %727 = vmatprep.mubr.f32.mxu1 %v1540_v0  ;;  %1292 = vmatprep.subr.bf16.mxu0 %v1291_v21  ;;  %v199_v21 = vld [vmem:[#allocation5 + $0x418] sm:$0xff]  ;;  %v1311_v27 = vpack.c.bf16 %v209_v19, %v197_v18 }
  0x7d   :  { %615 = vmatmul.mubr.f32.vlgmr.msra.gmra.mrb[16].mxu0 %v1620_v46  ;;  %1324 = vmatprep.subr.bf16.mxu1 %v1323_v25  ;;  %v196_v25 = vld [vmem:[#allocation5 + $0x400] sm:$0xff]  ;;  %v1343_v30 = vpack.c.bf16 %v211_v23, %v199_v21 }
  0x7e   :  { %728 = vmatmul.mubr.f32.vlgmr.msra.gmra.mrb[16].mxu1 %v1620_v46  ;;  %1294 = vmatpush1.bf16.msra.mxu0 %v1293_v28  ;;  %v198_v28 = vld [vmem:[#allocation5 + $0x410] sm:$0xff]  ;;  %v1313_v33 = vpack.c.bf16 %v208_v26, %v196_v25 }
  0x7f   :  { %1326 = vmatpush1.bf16.msra.mxu1 %v1325_v31  ;;  %620 = vmatprep.mubr.f32.mxu0 %v1540_v0  ;;  %v221_v31 = vld [vmem:[#allocation5 + $0x4c8] sm:$0xff]  ;;  %v1345_v37 = vpack.c.bf16 %v210_v29, %v198_v28 }
  0x80   :  { %733 = vmatprep.mubr.f32.mxu1 %v1540_v0  ;;  %1296 = vmatprep.subr.bf16.mxu0 %v1295_v34  ;;  %v223_v34 = vld [vmem:[#allocation5 + $0x4d8] sm:$0xff]  ;;  %v1315_v40 = vpack.c.bf16 %v233_v32, %v221_v31 }
  0x81   :  { %621 = vmatmul.mubr.f32.gmra.mrb[18].mxu0 %v1624_v59  ;;  %1328 = vmatprep.subr.bf16.mxu1 %v1327_v38  ;;  %v220_v38 = vld [vmem:[#allocation5 + $0x4c0] sm:$0xff]  ;;  %v1347_v43 = vpack.c.bf16 %v235_v36, %v223_v34 }
  0x82   :  { %734 = vmatmul.mubr.f32.gmra.mrb[18].mxu1 %v1624_v59  ;;  %1298 = vmatpush1.bf16.msra.mxu0 %v1297_v41  ;;  %v222_v41 = vld [vmem:[#allocation5 + $0x4d0] sm:$0xff]  ;;  %v1317_v47 = vpack.c.bf16 %v232_v39, %v220_v38 }
  0x83   :  { %1330 = vmatpush1.bf16.msra.mxu1 %v1329_v44  ;;  %626 = vmatprep.mubr.f32.mxu0 %v1540_v0  ;;  %v245_v44 = vld [vmem:[#allocation5 + $0x588] sm:$0xff]  ;;  %v1349_v51 = vpack.c.bf16 %v234_v42, %v222_v41 }
  0x84   :  { %739 = vmatprep.mubr.f32.mxu1 %v1540_v0  ;;  %1300 = vmatprep.subr.bf16.mxu0 %v1299_v48  ;;  %v247_v48 = vld [vmem:[#allocation5 + $0x598] sm:$0xff]  ;;  %v1319_v54 = vpack.c.bf16 %v257_v45, %v245_v44 }
  0x85   :  { %627 = vmatmul.mubr.f32.gmra.mrb[20].mxu0 %v1630_v9  ;;  %1332 = vmatprep.subr.bf16.mxu1 %v1331_v52  ;;  %v244_v52 = vld [vmem:[#allocation5 + $0x580] sm:$0xff]  ;;  %v1351_v57 = vpack.c.bf16 %v259_v50, %v247_v48 }
  0x86   :  { %740 = vmatmul.mubr.f32.gmra.mrb[20].mxu1 %v1630_v9  ;;  %1302 = vmatpush1.bf16.msra.mxu0 %v1301_v55  ;;  %v246_v55 = vld [vmem:[#allocation5 + $0x590] sm:$0xff] }
  0x87   :  { %1334 = vmatpush1.bf16.msra.mxu1 %v1333_v58  ;;  %632 = vmatprep.mubr.f32.mxu0 %v1540_v0  ;;  %v1321_v58 = vpack.c.bf16 %v256_v53, %v244_v52  ;;  %v1353_v60 = vpack.c.bf16 %v258_v56, %v246_v55 }
  0x88   :  { %745 = vmatprep.mubr.f32.mxu1 %v1540_v0  ;;  %1304 = vmatprep.subr.bf16.mxu0 %v1303_v62 }
  0x89   :  { %633 = vmatmul.mubr.f32.gmra.mrb[22].mxu0 %v1636_v22  ;;  %1336 = vmatprep.subr.bf16.mxu1 %v1335_v3 }
  0x8a   :  { %746 = vmatmul.mubr.f32.gmra.mrb[22].mxu1 %v1636_v22  ;;  %1306 = vmatpush1.bf16.msra.mxu0 %v1305_v6 }
  0x8b   :  { %1338 = vmatpush1.bf16.msra.mxu1 %v1337_v10  ;;  %638 = vmatprep.mubr.f32.mxu0 %v1540_v0 }
  0x8c   :  { %751 = vmatprep.mubr.f32.mxu1 %v1540_v0  ;;  %1308 = vmatprep.subr.bf16.mxu0 %v1307_v13 }
  0x8d   :  { %639 = vmatmul.mubr.f32.gmra.mrb[24].mxu0 %v1642_v35  ;;  %1340 = vmatprep.subr.bf16.mxu1 %v1339_v17 }
  0x8e   :  { %752 = vmatmul.mubr.f32.gmra.mrb[24].mxu1 %v1642_v35  ;;  %1310 = vmatpush1.bf16.msra.mxu0 %v1309_v20 }
  0x8f   :  { %1342 = vmatpush1.bf16.msra.mxu1 %v1341_v24  ;;  %644 = vmatprep.mubr.f32.mxu0 %v1540_v0 }
  0x90   :  { %757 = vmatprep.mubr.f32.mxu1 %v1540_v0  ;;  %1312 = vmatprep.subr.bf16.mxu0 %v1311_v27 }
  0x91   :  { %645 = vmatmul.mubr.f32.gmra.mrb[26].mxu0 %v1648_v49  ;;  %1344 = vmatprep.subr.bf16.mxu1 %v1343_v30 }
  0x92   :  { %758 = vmatmul.mubr.f32.gmra.mrb[26].mxu1 %v1648_v49  ;;  %1314 = vmatpush1.bf16.msra.mxu0 %v1313_v33 }
  0x93   :  { %1346 = vmatpush1.bf16.msra.mxu1 %v1345_v37  ;;  %650 = vmatprep.mubr.f32.mxu0 %v1540_v0 }
  0x94   :  { %763 = vmatprep.mubr.f32.mxu1 %v1540_v0  ;;  %1316 = vmatprep.subr.bf16.mxu0 %v1315_v40 }
  0x95   :  { %651 = vmatmul.mubr.f32.gmra.mrb[28].mxu0 %v1654_v63  ;;  %1348 = vmatprep.subr.bf16.mxu1 %v1347_v43 }
  0x96   :  { %764 = vmatmul.mubr.f32.gmra.mrb[28].mxu1 %v1654_v63  ;;  %1318 = vmatpush1.bf16.msra.mxu0 %v1317_v47 }
  0x97   :  { %1350 = vmatpush1.bf16.msra.mxu1 %v1349_v51  ;;  %656 = vmatprep.mubr.f32.mxu0 %v1540_v0 }
  0x98   :  { %769 = vmatprep.mubr.f32.mxu1 %v1540_v0  ;;  %1320 = vmatprep.subr.bf16.mxu0 %v1319_v54 }
  0x99   :  { %657 = vmatmul.mubr.f32.gmra.mrb[30].mxu0 %v1660_v14  ;;  %1352 = vmatprep.subr.bf16.mxu1 %v1351_v57 }
  0x9a   :  { %770 = vmatmul.mubr.f32.gmra.mrb[30].mxu1 %v1660_v14  ;;  %1322 = vmatpush1.bf16.msra.mxu0 %v1321_v58 }
  0x9b   :  { %1354 = vmatpush1.bf16.msra.mxu1 %v1353_v60  ;;  %840 = vmatprep.mubr.f32.mxu0 %v1540_v0 }
  0x9c   :  { %953 = vmatprep.mubr.f32.mxu1 %v1540_v0 }
  0x9d   :  { %841 = vmatmul.mubr.f32.vlgmr.msra.gmra.mrb[32].mxu0 %v1620_v46 }
  0x9e   :  { %954 = vmatmul.mubr.f32.vlgmr.msra.gmra.mrb[32].mxu1 %v1620_v46  ;;  %846 = vmatprep.mubr.f32.mxu0 %v1540_v0  ;;  %v264_v46 = vlaneseq }
  0x9f   :  { %959 = vmatprep.mubr.f32.mxu1 %v1540_v0 }
  0xa1   :  { %847 = vmatmul.mubr.f32.gmra.mrb[34].mxu0 %v1624_v59 }
  0xa2   :  { %960 = vmatmul.mubr.f32.gmra.mrb[34].mxu1 %v1624_v59  ;;  %852 = vmatprep.mubr.f32.mxu0 %v1540_v0  ;;  %v1730_v59 = vshrl.u32 %v264_v46, 7 }
  0xa3   :  { %965 = vmatprep.mubr.f32.mxu1 %v1540_v0 }
  0xa4   :  { %v282_v60 = vsub.s32 4, %v1730_v59 }
  0xa5   :  { %853 = vmatmul.mubr.f32.gmra.mrb[36].mxu0 %v1630_v9 }
  0xa6   :  { %966 = vmatmul.mubr.f32.gmra.mrb[36].mxu1 %v1630_v9  ;;  %858 = vmatprep.mubr.f32.mxu0 %v1540_v0  ;;  %v266_v9 = vsub.s32 0, %v1730_v59 }
  0xa7   :  { %971 = vmatprep.mubr.f32.mxu1 %v1540_v0 }
  0xa9   :  { %859 = vmatmul.mubr.f32.gmra.mrb[38].mxu0 %v1636_v22 }
  0xaa   :  { %972 = vmatmul.mubr.f32.gmra.mrb[38].mxu1 %v1636_v22  ;;  %864 = vmatprep.mubr.f32.mxu0 %v1540_v0  ;;  %v1733_v22 = vld [vmem:[#allocation7] sm:$0xff] }
  0xab   :  { %977 = vmatprep.mubr.f32.mxu1 %v1540_v0 }
  0xad   :  { %865 = vmatmul.mubr.f32.gmra.mrb[40].mxu0 %v1642_v35 }
  0xae   :  { %978 = vmatmul.mubr.f32.gmra.mrb[40].mxu1 %v1642_v35  ;;  %870 = vmatprep.mubr.f32.mxu0 %v1540_v0  ;;  %v274_v35 = vsub.s32 2, %v1730_v59 }
  0xaf   :  { %983 = vmatprep.mubr.f32.mxu1 %v1540_v0 }
  0xb1   :  { %871 = vmatmul.mubr.f32.gmra.mrb[42].mxu0 %v1648_v49 }
  0xb2   :  { %984 = vmatmul.mubr.f32.gmra.mrb[42].mxu1 %v1648_v49  ;;  %876 = vmatprep.mubr.f32.mxu0 %v1540_v0  ;;  %v270_v49 = vsub.s32 1, %v1730_v59 }
  0xb3   :  { %989 = vmatprep.mubr.f32.mxu1 %v1540_v0 }
  0xb4   :  { %v1751_v61 = vrot.slane %v1733_v22, %v270_v49 }
  0xb5   :  { %877 = vmatmul.mubr.f32.gmra.mrb[44].mxu0 %v1654_v63 }
  0xb6   :  { %990 = vmatmul.mubr.f32.gmra.mrb[44].mxu1 %v1654_v63  ;;  %882 = vmatprep.mubr.f32.mxu0 %v1540_v0  ;;  %v278_v63 = vsub.s32 3, %v1730_v59 }
  0xb7   :  { %995 = vmatprep.mubr.f32.mxu1 %v1540_v0  ;;  %v1741_v0 = vrot.slane %v1733_v22, %v266_v9 }
  0xb8   :  { %v1756_v62 = vrot.slane %v1733_v22, %v278_v63 }
  0xb9   :  { %883 = vmatmul.mubr.f32.gmra.mrb[46].mxu0 %v1660_v14 }
  0xba   :  { %996 = vmatmul.mubr.f32.gmra.mrb[46].mxu1 %v1660_v14  ;;  %v1746_v14 = vrot.slane %v1733_v22, %v274_v35 }
 0x130   :  { %v390_v1 = vpop.f32.mrb[0].mxu0 }
 0x131   :  { %v391_v2 = vadd.f32 %v390_v1, %v1741_v0  ;;  %v503_v3 = vpop.f32.mrb[0].mxu1  ;;  %v392_v4 = vpop.f32.mrb[1].mxu0 }
 0x132   :  { %v504_v5 = vadd.f32 %v503_v3, %v1746_v14  ;;  %v393_v6 = vadd.f32 %v392_v4, %v1751_v61  ;;  %v505_v7 = vpop.f32.mrb[1].mxu1  ;;  %v290_v3 = vsub.s32 6, %v1730_v59  ;;  %v286_v4 = vsub.s32 5, %v1730_v59 }
 0x133   :  { %1002 = vst [vmem:[#allocation8] sm:$0xff] %v391_v2  ;;  %v506_v8 = vadd.f32 %v505_v7, %v1756_v62 }
 0x134   :  { %1004 = vst [vmem:[#allocation8 + $0x10] sm:$0xff] %v504_v5  ;;  %1003 = vst [vmem:[#allocation8 + $0x8] sm:$0xff] %v393_v6  ;;  %v396_v10 = vpop.f32.mrb[2].mxu0  ;;  %v294_v6 = vsub.s32 7, %v1730_v59 }
 0x135   :  { %1026 = vst [vmem:[#allocation9] sm:$0xff] %v506_v8  ;;  %v397_v11 = vadd.f32 %v396_v10, %v1741_v0  ;;  %v509_v12 = vpop.f32.mrb[2].mxu1  ;;  %v398_v13 = vpop.f32.mrb[3].mxu0 }
 0x136   :  { %v510_v15 = vadd.f32 %v509_v12, %v1746_v14  ;;  %v399_v16 = vadd.f32 %v398_v13, %v1751_v61  ;;  %v511_v17 = vpop.f32.mrb[3].mxu1  ;;  %v1792_v12 = vrot.slane %v1733_v22, %v282_v60 }
 0x137   :  { %1005 = vst [vmem:[#allocation8 + $0x18] sm:$0xff] %v397_v11  ;;  %v512_v18 = vadd.f32 %v511_v17, %v1756_v62  ;;  %v1797_v17 = vrot.slane %v1733_v22, %v290_v3 }
 0x138   :  { %1007 = vst [vmem:[#allocation8 + $0x28] sm:$0xff] %v510_v15  ;;  %1006 = vst [vmem:[#allocation8 + $0x20] sm:$0xff] %v399_v16  ;;  %v402_v19 = vpop.f32.mrb[4].mxu0 }
 0x139   :  { %1029 = vst [vmem:[#allocation9 + $0x18] sm:$0xff] %v512_v18  ;;  %v403_v20 = vadd.f32 %v402_v19, %v1741_v0  ;;  %v515_v21 = vpop.f32.mrb[4].mxu1  ;;  %v404_v23 = vpop.f32.mrb[5].mxu0  ;;  %v1800_v18 = vrot.slane %v1733_v22, %v286_v4  ;;  %v1804_v19 = vrot.slane %v1733_v22, %v294_v6 }
 0x13a   :  { %v516_v24 = vadd.f32 %v515_v21, %v1746_v14  ;;  %v405_v25 = vadd.f32 %v404_v23, %v1751_v61  ;;  %v517_v26 = vpop.f32.mrb[5].mxu1 }
 0x13b   :  { %1008 = vst [vmem:[#allocation8 + $0x30] sm:$0xff] %v403_v20  ;;  %v518_v27 = vadd.f32 %v517_v26, %v1756_v62 }
 0x13c   :  { %1010 = vst [vmem:[#allocation8 + $0x40] sm:$0xff] %v516_v24  ;;  %1009 = vst [vmem:[#allocation8 + $0x38] sm:$0xff] %v405_v25  ;;  %v408_v28 = vpop.f32.mrb[6].mxu0 }
 0x13d   :  { %1032 = vst [vmem:[#allocation9 + $0x30] sm:$0xff] %v518_v27  ;;  %v409_v29 = vadd.f32 %v408_v28, %v1741_v0  ;;  %v521_v30 = vpop.f32.mrb[6].mxu1  ;;  %v410_v31 = vpop.f32.mrb[7].mxu0 }
 0x13e   :  { %v522_v32 = vadd.f32 %v521_v30, %v1746_v14  ;;  %v411_v33 = vadd.f32 %v410_v31, %v1751_v61  ;;  %v523_v34 = vpop.f32.mrb[7].mxu1 }
 0x13f   :  { %1011 = vst [vmem:[#allocation8 + $0x48] sm:$0xff] %v409_v29  ;;  %v524_v36 = vadd.f32 %v523_v34, %v1756_v62 }
 0x140   :  { %1013 = vst [vmem:[#allocation8 + $0x58] sm:$0xff] %v522_v32  ;;  %1012 = vst [vmem:[#allocation8 + $0x50] sm:$0xff] %v411_v33  ;;  %v414_v37 = vpop.f32.mrb[8].mxu0 }
 0x141   :  { %1035 = vst [vmem:[#allocation9 + $0x48] sm:$0xff] %v524_v36  ;;  %v415_v38 = vadd.f32 %v414_v37, %v1741_v0  ;;  %v527_v39 = vpop.f32.mrb[8].mxu1  ;;  %v416_v40 = vpop.f32.mrb[9].mxu0 }
 0x142   :  { %v528_v41 = vadd.f32 %v527_v39, %v1746_v14  ;;  %v417_v42 = vadd.f32 %v416_v40, %v1751_v61  ;;  %v529_v43 = vpop.f32.mrb[9].mxu1 }
 0x143   :  { %1014 = vst [vmem:[#allocation8 + $0x60] sm:$0xff] %v415_v38  ;;  %v530_v44 = vadd.f32 %v529_v43, %v1756_v62 }
 0x144   :  { %1016 = vst [vmem:[#allocation8 + $0x70] sm:$0xff] %v528_v41  ;;  %1015 = vst [vmem:[#allocation8 + $0x68] sm:$0xff] %v417_v42  ;;  %v420_v45 = vpop.f32.mrb[10].mxu0 }
 0x145   :  { %1038 = vst [vmem:[#allocation9 + $0x60] sm:$0xff] %v530_v44  ;;  %v421_v47 = vadd.f32 %v420_v45, %v1741_v0  ;;  %v533_v48 = vpop.f32.mrb[10].mxu1  ;;  %v422_v50 = vpop.f32.mrb[11].mxu0 }
 0x146   :  { %v534_v51 = vadd.f32 %v533_v48, %v1746_v14  ;;  %v423_v52 = vadd.f32 %v422_v50, %v1751_v61  ;;  %v535_v53 = vpop.f32.mrb[11].mxu1 }
 0x147   :  { %1017 = vst [vmem:[#allocation8 + $0x78] sm:$0xff] %v421_v47  ;;  %v536_v54 = vadd.f32 %v535_v53, %v1756_v62 }
 0x148   :  { %1019 = vst [vmem:[#allocation8 + $0x88] sm:$0xff] %v534_v51  ;;  %1018 = vst [vmem:[#allocation8 + $0x80] sm:$0xff] %v423_v52  ;;  %v426_v55 = vpop.f32.mrb[12].mxu0 }
 0x149   :  { %1041 = vst [vmem:[#allocation9 + $0x78] sm:$0xff] %v536_v54  ;;  %v427_v56 = vadd.f32 %v426_v55, %v1741_v0  ;;  %v539_v57 = vpop.f32.mrb[12].mxu1  ;;  %v428_v58 = vpop.f32.mrb[13].mxu0 }
 0x14a   :  { %v540_v46 = vadd.f32 %v539_v57, %v1746_v14  ;;  %v429_v1 = vadd.f32 %v428_v58, %v1751_v61  ;;  %v541_v2 = vpop.f32.mrb[13].mxu1 }
 0x14b   :  { %1020 = vst [vmem:[#allocation8 + $0x90] sm:$0xff] %v427_v56  ;;  %v542_v5 = vadd.f32 %v541_v2, %v1756_v62 }
 0x14c   :  { %1022 = vst [vmem:[#allocation8 + $0xa0] sm:$0xff] %v540_v46  ;;  %1021 = vst [vmem:[#allocation8 + $0x98] sm:$0xff] %v429_v1  ;;  %v432_v7 = vpop.f32.mrb[14].mxu0 }
 0x14d   :  { %1044 = vst [vmem:[#allocation9 + $0x90] sm:$0xff] %v542_v5  ;;  %v433_v8 = vadd.f32 %v432_v7, %v1741_v0  ;;  %v545_v10 = vpop.f32.mrb[14].mxu1  ;;  %v434_v11 = vpop.f32.mrb[15].mxu0 }
 0x14e   :  { %v546_v13 = vadd.f32 %v545_v10, %v1746_v14  ;;  %v435_v15 = vadd.f32 %v434_v11, %v1751_v61  ;;  %v547_v16 = vpop.f32.mrb[15].mxu1 }
 0x14f   :  { %1023 = vst [vmem:[#allocation8 + $0xa8] sm:$0xff] %v433_v8  ;;  %v548_v0 = vadd.f32 %v547_v16, %v1756_v62 }
 0x150   :  { %1025 = vst [vmem:[#allocation8 + $0xb8] sm:$0xff] %v546_v13  ;;  %1024 = vst [vmem:[#allocation8 + $0xb0] sm:$0xff] %v435_v15  ;;  %v616_v20 = vpop.f32.mrb[16].mxu0 }
 0x151   :  { %1047 = vst [vmem:[#allocation9 + $0xa8] sm:$0xff] %v548_v0  ;;  %v617_v14 = vadd.f32 %v616_v20, %v1792_v12  ;;  %v729_v61 = vpop.f32.mrb[16].mxu1  ;;  %v618_v21 = vpop.f32.mrb[17].mxu0 }
 0x152   :  { %1446 = shalt.err (!%p1443_p0)
}
 0x153   :  { %s1447_s15 = scalar_lea.hbm %s1956_s3, 3072 }
 0x154   :  { %p1448_p1 = scmp.ne.s32.totalorder %s1956_s3, %s1447_s15  ;;  %p1451_p2 = scmp.lt.u32.totalorder %s1447_s15, %s1956_s3 }
 0x156   :  { %p1453_p3 = pnand %p1451_p2, %p1448_p1 }
 0x158   :  { %1456 = shalt.err (!%p1453_p3)
}
 0x159   :  { %s1542_s20 = smov 384   ;;  %s1543_s1 = smov 24   ;;  %v730_v22 = vadd.f32 %v729_v61, %v1797_v17  ;;  %v619_v62 = vadd.f32 %v618_v21, %v1800_v18  ;;  %v731_v23 = vpop.f32.mrb[17].mxu1  ;;  %1027 = vst [vmem:[#allocation9 + $0x8] sm:$0xff] %v617_v14  ;;  %v622_v25 = vpop.f32.mrb[18].mxu0 }
 0x15a   :  { %1109 = dma.vmem_to_hbm [thread:$0]  %s1104_s11, 3072, %s1956_s3, [#allocation4], %s1542_s20, %s1542_s20, %s1543_s1   ;;  %v732_v24 = vadd.f32 %v731_v23, %v1804_v19  ;;  %v623_v26 = vadd.f32 %v622_v25, %v1792_v12  ;;  %v735_v27 = vpop.f32.mrb[18].mxu1  ;;  %v624_v28 = vpop.f32.mrb[19].mxu0  ;;  %v261_v20 = vld [vmem:[#allocation7 + $0x8] sm:$0xf] }
 0x15b   :  { %1050 = vst [vmem:[#allocation11] sm:$0xff] %v730_v22  ;;  %1028 = vst [vmem:[#allocation9 + $0x10] sm:$0xff] %v619_v62  ;;  %v736_v29 = vadd.f32 %v735_v27, %v1797_v17  ;;  %v625_v30 = vadd.f32 %v624_v28, %v1800_v18  ;;  %v737_v31 = vpop.f32.mrb[19].mxu1  ;;  %v628_v33 = vpop.f32.mrb[20].mxu0  ;;  %s1544_s3 = smov [#allocation9]   ;;  %v1852_v23 = vrot.slane %v261_v20, %v266_v9 }
 0x15c   :  { %1051 = vst [vmem:[#allocation11 + $0x8] sm:$0xff] %v732_v24  ;;  %1030 = vst [vmem:[#allocation9 + $0x20] sm:$0xff] %v623_v26  ;;  %v738_v32 = vadd.f32 %v737_v31, %v1804_v19  ;;  %v629_v34 = vadd.f32 %v628_v33, %v1792_v12  ;;  %v741_v36 = vpop.f32.mrb[20].mxu1  ;;  %v630_v37 = vpop.f32.mrb[21].mxu0  ;;  %s1115_s23 = sshll.u32 %s1544_s3, 4  ;;  %v1858_v27 = vrot.slane %v261_v20, %v274_v35  ;;  %s1116_s23 = int_to_ptr.vmem [resolvable:$true] %s1115_s23 }
 0x15d   :  { %1053 = vst [vmem:[#allocation11 + $0x18] sm:$0xff] %v736_v29  ;;  %1031 = vst [vmem:[#allocation9 + $0x28] sm:$0xff] %v625_v30  ;;  %v742_v38 = vadd.f32 %v741_v36, %v1797_v17  ;;  %v631_v39 = vadd.f32 %v630_v37, %v1800_v18  ;;  %v743_v40 = vpop.f32.mrb[21].mxu1  ;;  %v634_v42 = vpop.f32.mrb[22].mxu0  ;;  %v1862_v28 = vrot.slane %v261_v20, %v270_v49  ;;  %s1457_s24 = scalar_lea.vmem %s1116_s23, 3072  ;;  %p1462_p5 = scmp.lt.s32.totalorder %s1116_s23, %s1116_s23 }
 0x15e   :  { %1054 = vst [vmem:[#allocation11 + $0x20] sm:$0xff] %v738_v32  ;;  %1033 = vst [vmem:[#allocation9 + $0x38] sm:$0xff] %v629_v34  ;;  %v744_v41 = vadd.f32 %v743_v40, %v1804_v19  ;;  %v635_v43 = vadd.f32 %v634_v42, %v1792_v12  ;;  %v747_v44 = vpop.f32.mrb[22].mxu1  ;;  %v636_v45 = vpop.f32.mrb[23].mxu0  ;;  %v1867_v9 = vrot.slane %v261_v20, %v278_v63  ;;  %p1458_p4 = scmp.ne.s32.totalorder %s1116_s23, %s1457_s24  ;;  %p1463_p6 = scmp.lt.s32.totalorder %s1457_s24, %s1457_s24 }
 0x15f   :  { %1056 = vst [vmem:[#allocation11 + $0x30] sm:$0xff] %v742_v38  ;;  %1034 = vst [vmem:[#allocation9 + $0x40] sm:$0xff] %v631_v39  ;;  %v748_v47 = vadd.f32 %v747_v44, %v1797_v17  ;;  %v637_v48 = vadd.f32 %v636_v45, %v1800_v18  ;;  %v749_v50 = vpop.f32.mrb[23].mxu1 }
 0x160   :  { %1057 = vst [vmem:[#allocation11 + $0x38] sm:$0xff] %v744_v41  ;;  %1036 = vst [vmem:[#allocation9 + $0x50] sm:$0xff] %v635_v43  ;;  %v750_v51 = vadd.f32 %v749_v50, %v1804_v19  ;;  %v640_v52 = vpop.f32.mrb[24].mxu0  ;;  %p1464_p7 = por %p1463_p6, %p1462_p5 }
 0x161   :  { %1059 = vst [vmem:[#allocation11 + $0x48] sm:$0xff] %v748_v47  ;;  %1037 = vst [vmem:[#allocation9 + $0x58] sm:$0xff] %v637_v48  ;;  %v641_v53 = vadd.f32 %v640_v52, %v1792_v12  ;;  %v753_v54 = vpop.f32.mrb[24].mxu1  ;;  %v642_v55 = vpop.f32.mrb[25].mxu0 }
 0x162   :  { %1060 = vst [vmem:[#allocation11 + $0x50] sm:$0xff] %v750_v51  ;;  %v754_v56 = vadd.f32 %v753_v54, %v1797_v17  ;;  %v643_v57 = vadd.f32 %v642_v55, %v1800_v18  ;;  %v755_v58 = vpop.f32.mrb[25].mxu1  ;;  %p1465_p8 = pnand %p1464_p7, %p1458_p4 }
 0x163   :  { %1039 = vst [vmem:[#allocation9 + $0x68] sm:$0xff] %v641_v53  ;;  %v756_v60 = vadd.f32 %v755_v58, %v1804_v19 }
 0x164   :  { %1062 = vst [vmem:[#allocation11 + $0x60] sm:$0xff] %v754_v56  ;;  %1040 = vst [vmem:[#allocation9 + $0x70] sm:$0xff] %v643_v57  ;;  %v646_v46 = vpop.f32.mrb[26].mxu0 }
 0x165   :  { %1063 = vst [vmem:[#allocation11 + $0x68] sm:$0xff] %v756_v60  ;;  %v647_v1 = vadd.f32 %v646_v46, %v1792_v12  ;;  %v759_v2 = vpop.f32.mrb[26].mxu1  ;;  %v648_v3 = vpop.f32.mrb[27].mxu0 }
 0x166   :  { %v760_v4 = vadd.f32 %v759_v2, %v1797_v17  ;;  %v649_v5 = vadd.f32 %v648_v3, %v1800_v18  ;;  %v761_v6 = vpop.f32.mrb[27].mxu1 }
 0x167   :  { %1042 = vst [vmem:[#allocation9 + $0x80] sm:$0xff] %v647_v1  ;;  %v762_v7 = vadd.f32 %v761_v6, %v1804_v19 }
 0x168   :  { %1065 = vst [vmem:[#allocation11 + $0x78] sm:$0xff] %v760_v4  ;;  %1043 = vst [vmem:[#allocation9 + $0x88] sm:$0xff] %v649_v5  ;;  %v652_v8 = vpop.f32.mrb[28].mxu0 }
 0x169   :  { %1066 = vst [vmem:[#allocation11 + $0x80] sm:$0xff] %v762_v7  ;;  %v653_v10 = vadd.f32 %v652_v8, %v1792_v12  ;;  %v765_v11 = vpop.f32.mrb[28].mxu1  ;;  %v654_v13 = vpop.f32.mrb[29].mxu0 }
 0x16a   :  { %v766_v15 = vadd.f32 %v765_v11, %v1797_v17  ;;  %v655_v16 = vadd.f32 %v654_v13, %v1800_v18  ;;  %v767_v0 = vpop.f32.mrb[29].mxu1 }
 0x16b   :  { %1045 = vst [vmem:[#allocation9 + $0x98] sm:$0xff] %v653_v10  ;;  %v768_v14 = vadd.f32 %v767_v0, %v1804_v19 }
 0x16c   :  { %1068 = vst [vmem:[#allocation11 + $0x90] sm:$0xff] %v766_v15  ;;  %1046 = vst [vmem:[#allocation9 + $0xa0] sm:$0xff] %v655_v16  ;;  %v658_v61 = vpop.f32.mrb[30].mxu0 }
 0x16d   :  { %1069 = vst [vmem:[#allocation11 + $0x98] sm:$0xff] %v768_v14  ;;  %v659_v21 = vadd.f32 %v658_v61, %v1792_v12  ;;  %v771_v22 = vpop.f32.mrb[30].mxu1  ;;  %v660_v62 = vpop.f32.mrb[31].mxu0 }
 0x16e   :  { %v772_v24 = vadd.f32 %v771_v22, %v1797_v17  ;;  %v661_v25 = vadd.f32 %v660_v62, %v1800_v18  ;;  %v773_v26 = vpop.f32.mrb[31].mxu1 }
 0x16f   :  { %1048 = vst [vmem:[#allocation9 + $0xb0] sm:$0xff] %v659_v21  ;;  %v774_v12 = vadd.f32 %v773_v26, %v1804_v19 }
 0x170   :  { %1071 = vst [vmem:[#allocation11 + $0xa8] sm:$0xff] %v772_v24  ;;  %1049 = vst [vmem:[#allocation9 + $0xb8] sm:$0xff] %v661_v25  ;;  %v842_v17 = vpop.f32.mrb[32].mxu0 }
 0x171   :  { %1072 = vst [vmem:[#allocation11 + $0xb0] sm:$0xff] %v774_v12  ;;  %v843_v18 = vadd.f32 %v842_v17, %v1852_v23  ;;  %v955_v35 = vpop.f32.mrb[32].mxu1  ;;  %v844_v29 = vpop.f32.mrb[33].mxu0 }
 0x172   :  { %1468 = shalt.err (!%p1465_p8)
}
 0x173   :  { %s1469_s27 = scalar_lea.hbm %s1957_s4, 3072 }
 0x174   :  { %p1470_p9 = scmp.ne.s32.totalorder %s1957_s4, %s1469_s27  ;;  %p1473_p10 = scmp.lt.u32.totalorder %s1469_s27, %s1957_s4 }
 0x176   :  { %p1475_p11 = pnand %p1473_p10, %p1470_p9 }
 0x178   :  { %1478 = shalt.err (!%p1475_p11)
}
 0x179   :  { %1121 = dma.vmem_to_hbm [thread:$0]  %s1116_s23, 3072, %s1957_s4, [#allocation10], %s1542_s20, %s1542_s20, %s1543_s1   ;;  %v956_v59 = vadd.f32 %v955_v35, %v1858_v27  ;;  %v845_v49 = vadd.f32 %v844_v29, %v1862_v28  ;;  %v957_v63 = vpop.f32.mrb[33].mxu1  ;;  %1052 = vst [vmem:[#allocation11 + $0x10] sm:$0xff] %v843_v18  ;;  %v848_v30 = vpop.f32.mrb[34].mxu0 }
 0x17a   :  { %v958_v19 = vadd.f32 %v957_v63, %v1867_v9  ;;  %v849_v31 = vadd.f32 %v848_v30, %v1852_v23  ;;  %v961_v32 = vpop.f32.mrb[34].mxu1  ;;  %v850_v33 = vpop.f32.mrb[35].mxu0  ;;  %s1545_s4 = smov [#allocation11]   ;;  %s1546_s10 = smov [#allocation12]  }
 0x17b   :  { %1075 = vst [vmem:[#allocation12 + $0x8] sm:$0xff] %v956_v59  ;;  %1074 = vst [vmem:[#allocation12] sm:$0xff] %v845_v49  ;;  %v962_v34 = vadd.f32 %v961_v32, %v1858_v27  ;;  %v851_v36 = vadd.f32 %v850_v33, %v1862_v28  ;;  %v963_v37 = vpop.f32.mrb[35].mxu1  ;;  %v854_v39 = vpop.f32.mrb[36].mxu0  ;;  %s1127_s0 = sshll.u32 %s1545_s4, 4  ;;  %s1139_s2 = sshll.u32 %s1546_s10, 4  ;;  %s1128_s0 = int_to_ptr.vmem [resolvable:$true] %s1127_s0  ;;  %s1916_s2 = int_to_ptr.vmem [resolvable:$true] %s1139_s2 }
 0x17c   :  { %1076 = vst [vmem:[#allocation12 + $0x10] sm:$0xff] %v958_v19  ;;  %1055 = vst [vmem:[#allocation11 + $0x28] sm:$0xff] %v849_v31  ;;  %v964_v38 = vadd.f32 %v963_v37, %v1867_v9  ;;  %v855_v40 = vadd.f32 %v854_v39, %v1852_v23  ;;  %v967_v41 = vpop.f32.mrb[36].mxu1  ;;  %v856_v42 = vpop.f32.mrb[37].mxu0  ;;  %s1479_s11 = scalar_lea.vmem %s1128_s0, 3072  ;;  %p1484_p13 = scmp.lt.s32.totalorder %s1128_s0, %s1128_s0 }
 0x17d   :  { %1078 = vst [vmem:[#allocation12 + $0x20] sm:$0xff] %v962_v34  ;;  %1077 = vst [vmem:[#allocation12 + $0x18] sm:$0xff] %v851_v36  ;;  %v968_v43 = vadd.f32 %v967_v41, %v1858_v27  ;;  %v857_v44 = vadd.f32 %v856_v42, %v1862_v28  ;;  %v969_v45 = vpop.f32.mrb[37].mxu1  ;;  %v860_v48 = vpop.f32.mrb[38].mxu0  ;;  %p1480_p12 = scmp.ne.s32.totalorder %s1128_s0, %s1479_s11  ;;  %p1485_p0 = scmp.lt.s32.totalorder %s1479_s11, %s1479_s11 }
 0x17e   :  { %1079 = vst [vmem:[#allocation12 + $0x28] sm:$0xff] %v964_v38  ;;  %1058 = vst [vmem:[#allocation11 + $0x40] sm:$0xff] %v855_v40  ;;  %v970_v47 = vadd.f32 %v969_v45, %v1867_v9  ;;  %v861_v50 = vadd.f32 %v860_v48, %v1852_v23  ;;  %v973_v51 = vpop.f32.mrb[38].mxu1  ;;  %v862_v52 = vpop.f32.mrb[39].mxu0 }
 0x17f   :  { %1081 = vst [vmem:[#allocation12 + $0x38] sm:$0xff] %v968_v43  ;;  %1080 = vst [vmem:[#allocation12 + $0x30] sm:$0xff] %v857_v44  ;;  %v974_v53 = vadd.f32 %v973_v51, %v1858_v27  ;;  %v863_v54 = vadd.f32 %v862_v52, %v1862_v28  ;;  %v975_v55 = vpop.f32.mrb[39].mxu1  ;;  %p1486_p1 = por %p1485_p0, %p1484_p13 }
 0x180   :  { %1082 = vst [vmem:[#allocation12 + $0x40] sm:$0xff] %v970_v47  ;;  %1061 = vst [vmem:[#allocation11 + $0x58] sm:$0xff] %v861_v50  ;;  %v976_v56 = vadd.f32 %v975_v55, %v1867_v9  ;;  %v866_v57 = vpop.f32.mrb[40].mxu0 }
 0x181   :  { %1084 = vst [vmem:[#allocation12 + $0x50] sm:$0xff] %v974_v53  ;;  %1083 = vst [vmem:[#allocation12 + $0x48] sm:$0xff] %v863_v54  ;;  %v867_v58 = vadd.f32 %v866_v57, %v1852_v23  ;;  %v979_v60 = vpop.f32.mrb[40].mxu1  ;;  %v868_v46 = vpop.f32.mrb[41].mxu0  ;;  %p1487_p2 = pnand %p1486_p1, %p1480_p12 }
 0x182   :  { %1085 = vst [vmem:[#allocation12 + $0x58] sm:$0xff] %v976_v56  ;;  %v980_v1 = vadd.f32 %v979_v60, %v1858_v27  ;;  %v869_v2 = vadd.f32 %v868_v46, %v1862_v28  ;;  %v981_v3 = vpop.f32.mrb[41].mxu1 }
 0x183   :  { %1064 = vst [vmem:[#allocation11 + $0x70] sm:$0xff] %v867_v58  ;;  %v982_v4 = vadd.f32 %v981_v3, %v1867_v9 }
 0x184   :  { %1087 = vst [vmem:[#allocation12 + $0x68] sm:$0xff] %v980_v1  ;;  %1086 = vst [vmem:[#allocation12 + $0x60] sm:$0xff] %v869_v2  ;;  %v872_v5 = vpop.f32.mrb[42].mxu0 }
 0x185   :  { %1088 = vst [vmem:[#allocation12 + $0x70] sm:$0xff] %v982_v4  ;;  %v873_v6 = vadd.f32 %v872_v5, %v1852_v23  ;;  %v985_v7 = vpop.f32.mrb[42].mxu1  ;;  %v874_v8 = vpop.f32.mrb[43].mxu0 }
 0x186   :  { %v986_v10 = vadd.f32 %v985_v7, %v1858_v27  ;;  %v875_v11 = vadd.f32 %v874_v8, %v1862_v28  ;;  %v987_v13 = vpop.f32.mrb[43].mxu1 }
 0x187   :  { %1067 = vst [vmem:[#allocation11 + $0x88] sm:$0xff] %v873_v6  ;;  %v988_v15 = vadd.f32 %v987_v13, %v1867_v9 }
 0x188   :  { %1090 = vst [vmem:[#allocation12 + $0x80] sm:$0xff] %v986_v10  ;;  %1089 = vst [vmem:[#allocation12 + $0x78] sm:$0xff] %v875_v11  ;;  %v878_v16 = vpop.f32.mrb[44].mxu0 }
 0x189   :  { %1091 = vst [vmem:[#allocation12 + $0x88] sm:$0xff] %v988_v15  ;;  %v879_v0 = vadd.f32 %v878_v16, %v1852_v23  ;;  %v991_v20 = vpop.f32.mrb[44].mxu1  ;;  %v880_v14 = vpop.f32.mrb[45].mxu0 }
 0x18a   :  { %v992_v61 = vadd.f32 %v991_v20, %v1858_v27  ;;  %v881_v21 = vadd.f32 %v880_v14, %v1862_v28  ;;  %v993_v22 = vpop.f32.mrb[45].mxu1 }
 0x18b   :  { %1070 = vst [vmem:[#allocation11 + $0xa0] sm:$0xff] %v879_v0  ;;  %v994_v62 = vadd.f32 %v993_v22, %v1867_v9 }
 0x18c   :  { %1093 = vst [vmem:[#allocation12 + $0x98] sm:$0xff] %v992_v61  ;;  %1092 = vst [vmem:[#allocation12 + $0x90] sm:$0xff] %v881_v21  ;;  %v884_v24 = vpop.f32.mrb[46].mxu0 }
 0x18d   :  { %1094 = vst [vmem:[#allocation12 + $0xa0] sm:$0xff] %v994_v62  ;;  %v885_v25 = vadd.f32 %v884_v24, %v1852_v23  ;;  %v997_v26 = vpop.f32.mrb[46].mxu1  ;;  %v886_v12 = vpop.f32.mrb[47].mxu0 }
 0x18e   :  { %v998_v17 = vadd.f32 %v997_v26, %v1858_v27  ;;  %v887_v18 = vadd.f32 %v886_v12, %v1862_v28  ;;  %v999_v35 = vpop.f32.mrb[47].mxu1 }
 0x18f   :  { %1073 = vst [vmem:[#allocation11 + $0xb8] sm:$0xff] %v885_v25  ;;  %v1000_v29 = vadd.f32 %v999_v35, %v1867_v9 }
 0x190   :  { %1096 = vst [vmem:[#allocation12 + $0xb0] sm:$0xff] %v998_v17  ;;  %1095 = vst [vmem:[#allocation12 + $0xa8] sm:$0xff] %v887_v18 }
 0x191   :  { %1490 = shalt.err (!%p1487_p2)
}
 0x192   :  { %s1491_s14 = scalar_lea.hbm %s1958_s5, 3072 }
 0x193   :  { %p1492_p3 = scmp.ne.s32.totalorder %s1958_s5, %s1491_s14  ;;  %p1495_p4 = scmp.lt.u32.totalorder %s1491_s14, %s1958_s5 }
 0x195   :  { %p1497_p5 = pnand %p1495_p4, %p1492_p3 }
 0x197   :  { %1500 = shalt.err (!%p1497_p5)
}
 0x198   :  { %1133 = dma.vmem_to_hbm [thread:$0]  %s1128_s0, 3072, %s1958_s5, [#allocation10], %s1542_s20, %s1542_s20, %s1543_s1   ;;  %1097 = vst [vmem:[#allocation12 + $0xb8] sm:$0xff] %v1000_v29 }
 0x199   :  { %s1501_s22 = scalar_lea.vmem %s1916_s2, 3072  ;;  %p1506_p7 = scmp.lt.s32.totalorder %s1916_s2, %s1916_s2 }
 0x19a   :  { %p1502_p6 = scmp.ne.s32.totalorder %s1916_s2, %s1501_s22  ;;  %p1507_p8 = scmp.lt.s32.totalorder %s1501_s22, %s1501_s22 }
 0x19c   :  { %p1508_p9 = por %p1507_p8, %p1506_p7 }
 0x19e   :  { %p1509_p10 = pnand %p1508_p9, %p1502_p6 }
 0x1a0   :  { %1512 = shalt.err (!%p1509_p10)
}
 0x1a1   :  { %s1513_s24 = scalar_lea.hbm %s1959_s6, 3072 }
 0x1a2   :  { %p1514_p11 = scmp.ne.s32.totalorder %s1959_s6, %s1513_s24  ;;  %p1517_p12 = scmp.lt.u32.totalorder %s1513_s24, %s1959_s6 }
 0x1a4   :  { %p1519_p13 = pnand %p1517_p12, %p1514_p11 }
 0x1a6   :  { %1522 = shalt.err (!%p1519_p13)
}
 0x1a7   :  { %1145 = dma.vmem_to_hbm [thread:$0]  %s1916_s2, 3072, %s1959_s6, [#allocation13], %s1542_s20, %s1542_s20, %s1543_s1  }
 0x1a8   :  { %1527 = dma.done.wait [#allocation4], 3072  }
 0x1a9   :  { %1528 = vsyncadd [#allocation4], 4294964224 }
 0x1aa   :  { %1529 = dma.done.wait [#allocation10], 6144  }
 0x1ab   :  { %1530 = vsyncadd [#allocation10], 4294961152 }
 0x1ac   :  { %1531 = dma.done.wait [#allocation13], 3072  }
 0x1ad   :  { %1532 = vsyncadd [#allocation13], 4294964224 }
 0x1ae   :  { %1158 = vsyncpa [#allocation3], 1 }
 0x1af   :  { %1159 = vsyncpa [#allocation6], 1 }
 0x1b0   :  { %1160 = vsyncpa [#allocation4], 1 }
 0x1b1   :  { %1161 = vsyncpa [#allocation10], 1 }
 0x1b2   :  { %1162 = vsyncpa [#allocation13], 1 }

</bundles_post_ra>
